<compile_context>
chip_gen: v7x
topology: tpu7x:2x2x1
jax: 0.10.0
libtpu: 0.0.40
codegen_flags: <defaults>
</compile_context>

<pallas_src>
import functools

import jax
import jax.numpy as jnp
from jax.experimental import pallas as pl
from jax.experimental.pallas import tpu as pltpu

EPS = 1e-5
MATMUL_DTYPE = jnp.bfloat16      # MXU operand dtype (accumulation stays f32)
ACT_DTYPE = jnp.bfloat16         # layer I/O (HBM) dtype; in-kernel compute is f32


# ----------------------------- in-kernel helpers -----------------------------
def _layernorm(x, g, b):
    mean = jnp.mean(x, axis=-1, keepdims=True)
    var = jnp.mean((x - mean) ** 2, axis=-1, keepdims=True)
    return (x - mean) * jax.lax.rsqrt(var + EPS) * g + b


def _swish(x):
    return x * jax.nn.sigmoid(x)


def _mm(a, w, bias=None):
    """MXU matmul: bf16 operands, f32 accumulation, f32 bias add."""
    y = jnp.dot(a.astype(MATMUL_DTYPE), w.astype(MATMUL_DTYPE),
                preferred_element_type=jnp.float32)
    if bias is not None:
        y = y + bias
    return y


# --------------------------- per-batch-element body ---------------------------
def _layer_body(x, p, *, num_heads, head_dim, ksize):
    """One batch element. x: (T, C) f32; p: dict name -> VMEM ref (loaded at use)."""
    T, C = x.shape
    H, hd = num_heads, head_dim

    # ---------------- FFN1 (half-step residual) ----------------
    xn = _layernorm(x, p["f1_g"][...], p["f1_b"][...])
    hid = _swish(_mm(xn, p["f1_w1"][...], p["f1_b1"][...]))
    x = _mm(hid, p["f1_w2"][...], p["f1_b2"][...]) * 0.5 + x

    # ---------------- Multi-head self-attention ----------------
    xn = _layernorm(x, p["a_g"][...], p["a_b"][...]).astype(MATMUL_DTYPE)
    # Full-width lane-dense projections (head_dim**-0.5 folded into wq/bq).
    q2 = _mm(xn, p["wq"][...], p["bq"][...]).astype(MATMUL_DTYPE)   # (T, C)
    k2 = _mm(xn, p["wk"][...], p["bk"][...]).astype(MATMUL_DTYPE)
    v2 = _mm(xn, p["wv"][...], p["bv"][...]).astype(MATMUL_DTYPE)
    # Head split: static lane slices + stack (VMEM copies only, no narrow matmuls).
    q3 = jnp.stack([q2[:, i * hd:(i + 1) * hd] for i in range(H)], axis=0)
    k3 = jnp.stack([k2[:, i * hd:(i + 1) * hd] for i in range(H)], axis=0)
    v3 = jnp.stack([v2[:, i * hd:(i + 1) * hd] for i in range(H)], axis=0)
    s = jnp.einsum("htd,hsd->hts", q3, k3,
                   preferred_element_type=jnp.float32)              # (H, T, T)
    s = s - jnp.max(s, axis=-1, keepdims=True)
    pr = jnp.exp(s)
    pr = pr * pl.reciprocal(jnp.sum(pr, axis=-1, keepdims=True), approx=True)
    o3 = jnp.einsum("hts,hsd->htd", pr.astype(MATMUL_DTYPE), v3,
                    preferred_element_type=jnp.float32)             # (H, T, hd)
    # Output projection: concat heads on the lane axis, one (T,C)x(C,C) matmul.
    o2 = jnp.concatenate([o3[i] for i in range(H)], axis=-1)        # (T, C)
    x = _mm(o2, p["wo"][...], p["bo"][...]) + x

    # ---------------- Convolution module ----------------
    xn = _layernorm(x, p["c_g"][...], p["c_b"][...]).astype(MATMUL_DTYPE)
    g = _mm(xn, p["pw1_a"][...]) * jax.nn.sigmoid(_mm(xn, p["pw1_b"][...]))  # GLU
    # Depthwise conv over time (SAME zero padding): XLU rolls + cheap (T,1) masks.
    pad = (ksize - 1) // 2
    t_idx = jax.lax.broadcasted_iota(jnp.int32, (T, 1), 0)          # hoisted
    dw = p["dw"][...]                                               # (K, 1, C)
    acc = jnp.zeros((T, C), jnp.float32)
    for kk in range(ksize):
        d = kk - pad                                 # static tap offset in time
        sh = (-d) % T
        rolled = pltpu.roll(g, shift=sh, axis=0) if sh else g       # rolled[t]=g[t+d]
        if d > 0:
            rolled = jnp.where(t_idx < T - d, rolled, 0.0)
        elif d < 0:
            rolled = jnp.where(t_idx >= -d, rolled, 0.0)
        acc = acc + rolled * dw[kk]
    # BatchNorm1d (eval stats folded on host) + swish + pointwise_conv2
    y = _swish(acc * p["bn_scale"][...] + p["bn_shift"][...])
    x = _mm(y, p["pw2"][...]) + x

    # ---------------- FFN2 (half-step residual) + final LayerNorm ----------------
    xn = _layernorm(x, p["f2_g"][...], p["f2_b"][...])
    hid = _swish(_mm(xn, p["f2_w1"][...], p["f2_b1"][...]))
    y = _mm(hid, p["f2_w2"][...], p["f2_b2"][...])
    out = _layernorm(y * 0.5 + x, p["fin_g"][...], p["fin_b"][...])
    return out, y


# --------------------------------- kernel ------------------------------------
def conformer_layer_kernel(x_ref, *refs, num_heads, head_dim, ksize, param_names):
    out_ref, lres_ref = refs[-2], refs[-1]
    param_refs = refs[:-2]
    assert len(param_refs) == len(param_names)
    p = dict(zip(param_names, param_refs))          # refs, loaded at point of use
    x = x_ref[0].astype(jnp.float32)                # (T, C)
    out, lres = _layer_body(x, p, num_heads=num_heads, head_dim=head_dim,
                            ksize=ksize)
    out_ref[0] = out.astype(out_ref.dtype)
    lres_ref[0] = lres.astype(lres_ref.dtype)


# --------------------------- host-side param folding --------------------------
def _prepare_params(params, num_heads):
    """Fold / re-layout module parameters into kernel-friendly arrays (host-side)."""
    cd = MATMUL_DTYPE
    f1, f2, at = params["ffn1"], params["ffn2"], params["attn"]
    cv, fin = params["conv"], params["final"]
    C = f1["ln_g"].shape[-1]
    hd = C // num_heads
    scale = hd ** -0.5

    bn_scale = cv["bn_g"] * jax.lax.rsqrt(cv["bn_v"] + EPS)
    bn_shift = cv["bn_b"] - cv["bn_m"] * bn_scale

    return {
        "f1_g": f1["ln_g"], "f1_b": f1["ln_b"],
        "f1_w1": f1["w1"].astype(cd), "f1_b1": f1["b1"],
        "f1_w2": f1["w2"].astype(cd), "f1_b2": f1["b2"],
        "a_g": at["ln_g"], "a_b": at["ln_b"],
        "wq": (at["wq"] * scale).astype(cd), "bq": at["bq"] * scale,
        "wk": at["wk"].astype(cd), "bk": at["bk"],
        "wv": at["wv"].astype(cd), "bv": at["bv"],
        "wo": at["wo"].astype(cd), "bo": at["bo"],
        "c_g": cv["ln_g"], "c_b": cv["ln_b"],
        "pw1_a": cv["w_pw1"][:, :C].astype(cd),
        "pw1_b": cv["w_pw1"][:, C:].astype(cd),
        "dw": cv["w_dw"][:, None, :],                               # (K, 1, C)
        "bn_scale": bn_scale, "bn_shift": bn_shift,
        "pw2": cv["w_pw2"].astype(cd),
        "f2_g": f2["ln_g"], "f2_b": f2["ln_b"],
        "f2_w1": f2["w1"].astype(cd), "f2_b1": f2["b1"],
        "f2_w2": f2["w2"].astype(cd), "f2_b2": f2["b2"],
        "fin_g": fin["ln_g"], "fin_b": fin["ln_b"],
    }


def _pick_vmem_limit():
    """~3/4 of physical VMEM, capped at 96 MiB (48 MiB on v7x); safe fallback."""
    try:
        cap = int(pltpu.get_tpu_info().vmem_capacity_bytes)
        return min(cap * 3 // 4, 96 * 1024 * 1024)
    except Exception:
        return 48 * 1024 * 1024


# ------------------------------ full layer forward ----------------------------
def conformer_layer(x_btc, params, num_heads, dw_kernel_size):
    """Fused ConformerEncoderLayer forward.

    x_btc: (B, T, C) — the batch-major layout DiffConformerEncoder uses at the
    encoder level; working batch-major here removes the per-layer (T,B,C)
    transposes of the PyTorch code (pure layout ops, no math).
    Returns (out, layer_result), both (B, T, C) in bf16; attention weights are
    None (need_weights=False) and therefore not returned.
    """
    B, T, C = x_btc.shape
    assert C % num_heads == 0
    assert (dw_kernel_size - 1) % 2 == 0
    head_dim = C // num_heads

    p = _prepare_params(params, num_heads)
    names = tuple(p.keys())
    flat = [p[n] for n in names]

    x_in = x_btc.astype(ACT_DTYPE)   # bf16 at the HBM boundary (free when the
                                     # producing layer already emits bf16)

    def act_spec():
        return pl.BlockSpec((1, T, C), lambda b: (b, 0, 0))

    def rep_spec(a):                 # grid-invariant (replicated) parameter block
        nd = a.ndim
        return pl.BlockSpec(a.shape, lambda b, _nd=nd: (0,) * _nd)

    kernel = functools.partial(
        conformer_layer_kernel,
        num_heads=num_heads, head_dim=head_dim, ksize=dw_kernel_size,
        param_names=names)

    out, lres = pl.pallas_call(
        kernel,
        grid=(B,),
        in_specs=[act_spec()] + [rep_spec(a) for a in flat],
        out_specs=(act_spec(), act_spec()),
        out_shape=(jax.ShapeDtypeStruct((B, T, C), ACT_DTYPE),
                   jax.ShapeDtypeStruct((B, T, C), ACT_DTYPE)),
        compiler_params=pltpu.CompilerParams(
            dimension_semantics=("parallel",),
            vmem_limit_bytes=_pick_vmem_limit()),
    )(x_in, *flat)
    return out, lres


# ------------------------------ parameter init --------------------------------
def init_params(key, C, F, K):
    ks = jax.random.split(key, 24)
    w = lambda k, s, sc: jax.random.normal(k, s, jnp.float32) * sc
    ones = lambda: jnp.ones((1, C), jnp.float32)
    zeros = lambda: jnp.zeros((1, C), jnp.float32)

    ffn1 = dict(ln_g=ones(), ln_b=zeros(),
                w1=w(ks[0], (C, F), 0.1), b1=w(ks[1], (1, F), 0.1),
                w2=w(ks[2], (F, C), 0.1), b2=w(ks[3], (1, C), 0.1))
    ffn2 = dict(ln_g=ones(), ln_b=zeros(),
                w1=w(ks[4], (C, F), 0.1), b1=w(ks[5], (1, F), 0.1),
                w2=w(ks[6], (F, C), 0.1), b2=w(ks[7], (1, C), 0.1))
    attn = dict(ln_g=ones(), ln_b=zeros(),
                wq=w(ks[8], (C, C), 0.08), bq=w(ks[9], (1, C), 0.08),
                wk=w(ks[10], (C, C), 0.08), bk=w(ks[11], (1, C), 0.08),
                wv=w(ks[12], (C, C), 0.08), bv=w(ks[13], (1, C), 0.08),
                wo=w(ks[14], (C, C), 0.08), bo=w(ks[15], (1, C), 0.08))
    conv = dict(ln_g=ones(), ln_b=zeros(),
                w_pw1=w(ks[16], (C, 2 * C), 0.1),
                w_dw=w(ks[17], (K, C), 0.2),
                bn_g=ones(), bn_b=zeros(), bn_m=zeros(), bn_v=ones(),
                w_pw2=w(ks[18], (C, C), 0.1))
    fin = dict(ln_g=ones(), ln_b=zeros())
    return dict(ffn1=ffn1, ffn2=ffn2, attn=attn, conv=conv, final=fin)


# ------------------------ pure-JAX (non-Pallas) reference ----------------------
def _reference_layer(x_btc, params, num_heads, ksize):
    """Independent plain-jnp implementation (same bf16-operand matmul precision)."""
    cd = MATMUL_DTYPE

    def mm(a, w, b=None):
        y = jnp.dot(a.astype(cd), w.astype(cd), preferred_element_type=jnp.float32)
        return y if b is None else y + b

    def ln(v, g, b):
        m = jnp.mean(v, -1, keepdims=True)
        s = jnp.mean((v - m) ** 2, -1, keepdims=True)
        return (v - m) * jax.lax.rsqrt(s + EPS) * g + b

    B, T, C = x_btc.shape
    H = num_heads
    hd = C // H
    f1, f2, at = params["ffn1"], params["ffn2"], params["attn"]
    cv, fin = params["conv"], params["final"]

    x2 = x_btc.reshape(B * T, C).astype(jnp.float32)
    # FFN1
    y = mm(_swish(mm(ln(x2, f1["ln_g"], f1["ln_b"]), f1["w1"], f1["b1"])),
           f1["w2"], f1["b2"])
    x2 = y * 0.5 + x2
    # attention
    xn = ln(x2, at["ln_g"], at["ln_b"])
    q = (mm(xn, at["wq"], at["bq"]) * (hd ** -0.5)).reshape(B, T, H, hd)
    k = mm(xn, at["wk"], at["bk"]).reshape(B, T, H, hd)
    v = mm(xn, at["wv"], at["bv"]).reshape(B, T, H, hd)
    s = jnp.einsum("bthd,bshd->bhts", q.astype(cd), k.astype(cd),
                   preferred_element_type=jnp.float32)
    pr = jax.nn.softmax(s, axis=-1)
    o = jnp.einsum("bhts,bshd->bthd", pr.astype(cd), v.astype(cd),
                   preferred_element_type=jnp.float32).reshape(B * T, C)
    x2 = mm(o, at["wo"], at["bo"]) + x2
    # conv module (B, T, C)
    xb = x2.reshape(B, T, C)
    xn = ln(xb, cv["ln_g"], cv["ln_b"])
    hcat = mm(xn.reshape(B * T, C), cv["w_pw1"]).reshape(B, T, 2 * C)
    g = hcat[..., :C] * jax.nn.sigmoid(hcat[..., C:])
    pad = (ksize - 1) // 2
    gp = jnp.pad(g, ((0, 0), (pad, pad), (0, 0)))
    acc = jnp.zeros_like(g)
    for kk in range(ksize):
        acc = acc + gp[:, kk:kk + T, :] * cv["w_dw"][kk]
    yb = (acc - cv["bn_m"]) * jax.lax.rsqrt(cv["bn_v"] + EPS) * cv["bn_g"] + cv["bn_b"]
    yb = mm(_swish(yb).reshape(B * T, C), cv["w_pw2"])
    x2 = yb + x2
    # FFN2 + final LN
    y = mm(_swish(mm(ln(x2, f2["ln_g"], f2["ln_b"]), f2["w1"], f2["b1"])),
           f2["w2"], f2["b2"])
    lres = y.reshape(B, T, C)
    out = ln(y * 0.5 + x2, fin["ln_g"], fin["ln_b"]).reshape(B, T, C)
    return out, lres


# TODO(synk): encoder-level glue of DiffConformerEncoder (input projection,
# sinusoidal diffusion embedding + MLP, positional encoding, layer stack,
# out_proj) is not fused here; the reference forward() is internally
# inconsistent (passes cond/diffusion_step kwargs the layer does not accept),
# so only ConformerEncoderLayer.forward is provided as the Pallas kernel.


if __name__ == "__main__":
    B, T, C = 2, 16, 128        # batch, seq, embed_dim (C multiple of 128 -> lane-dense)
    F = 256                     # ffn_embed_dim
    H = 4                       # attention heads (head_dim = 32)
    K = 7                       # depthwise_conv_kernel_size (odd, SAME padding)

    key = jax.random.PRNGKey(0)
    kx, kp = jax.random.split(key)
    x = jax.random.normal(kx, (B, T, C), jnp.float32)
    params = init_params(kp, C, F, K)

    layer = jax.jit(functools.partial(conformer_layer, num_heads=H,
                                      dw_kernel_size=K))
    out, layer_result = layer(x, params)
    out = jax.block_until_ready(out)
    layer_result = jax.block_until_ready(layer_result)

    assert out.shape == (B, T, C) and layer_result.shape == (B, T, C)
    out_f = out.astype(jnp.float32)
    lres_f = layer_result.astype(jnp.float32)
    assert bool(jnp.all(jnp.isfinite(out_f)))
    assert bool(jnp.all(jnp.isfinite(lres_f)))

    # correctness: compare against an independent pure-JAX reference.
    # (Kernel I/O is bf16 and the softmax uses the approx EUP reciprocal, so
    # round the reference through bf16 as well and allow ~bf16-level tolerance.)
    xq = x.astype(jnp.bfloat16).astype(jnp.float32)
    ref_out, ref_lres = _reference_layer(xq, params, H, K)
    ref_out = ref_out.astype(jnp.bfloat16).astype(jnp.float32)
    ref_lres = ref_lres.astype(jnp.bfloat16).astype(jnp.float32)
    err = max(float(jnp.max(jnp.abs(out_f - ref_out))),
              float(jnp.max(jnp.abs(lres_f - ref_lres))))
    assert err < 5e-2, f"mismatch vs reference: max abs err {err}"

    print("KERNEL_OK")
</pallas_src>

<mosaic_0001>
module attributes {stable_mosaic.version = 11 : i64} {
  func.func @conformer_layer_kernel(%arg0: i32, %arg1: memref<1x16x128xbf16, #tpu.memory_space<vmem>>, %arg2: memref<1x128xf32, #tpu.memory_space<vmem>>, %arg3: memref<1x128xf32, #tpu.memory_space<vmem>>, %arg4: memref<128x256xbf16, #tpu.memory_space<vmem>>, %arg5: memref<1x256xf32, #tpu.memory_space<vmem>>, %arg6: memref<256x128xbf16, #tpu.memory_space<vmem>>, %arg7: memref<1x128xf32, #tpu.memory_space<vmem>>, %arg8: memref<1x128xf32, #tpu.memory_space<vmem>>, %arg9: memref<1x128xf32, #tpu.memory_space<vmem>>, %arg10: memref<128x128xbf16, #tpu.memory_space<vmem>>, %arg11: memref<1x128xf32, #tpu.memory_space<vmem>>, %arg12: memref<128x128xbf16, #tpu.memory_space<vmem>>, %arg13: memref<1x128xf32, #tpu.memory_space<vmem>>, %arg14: memref<128x128xbf16, #tpu.memory_space<vmem>>, %arg15: memref<1x128xf32, #tpu.memory_space<vmem>>, %arg16: memref<128x128xbf16, #tpu.memory_space<vmem>>, %arg17: memref<1x128xf32, #tpu.memory_space<vmem>>, %arg18: memref<1x128xf32, #tpu.memory_space<vmem>>, %arg19: memref<1x128xf32, #tpu.memory_space<vmem>>, %arg20: memref<128x128xbf16, #tpu.memory_space<vmem>>, %arg21: memref<128x128xbf16, #tpu.memory_space<vmem>>, %arg22: memref<7x1x128xf32, #tpu.memory_space<vmem>>, %arg23: memref<1x128xf32, #tpu.memory_space<vmem>>, %arg24: memref<1x128xf32, #tpu.memory_space<vmem>>, %arg25: memref<128x128xbf16, #tpu.memory_space<vmem>>, %arg26: memref<1x128xf32, #tpu.memory_space<vmem>>, %arg27: memref<1x128xf32, #tpu.memory_space<vmem>>, %arg28: memref<128x256xbf16, #tpu.memory_space<vmem>>, %arg29: memref<1x256xf32, #tpu.memory_space<vmem>>, %arg30: memref<256x128xbf16, #tpu.memory_space<vmem>>, %arg31: memref<1x128xf32, #tpu.memory_space<vmem>>, %arg32: memref<1x128xf32, #tpu.memory_space<vmem>>, %arg33: memref<1x128xf32, #tpu.memory_space<vmem>>, %arg34: memref<1x16x128xbf16, #tpu.memory_space<vmem>>, %arg35: memref<1x16x128xbf16, #tpu.memory_space<vmem>>) attributes {dimension_semantics = [#tpu.dimension_semantics<parallel>], iteration_bounds = array<i64: 2>, scalar_prefetch = 0 : i64, scratch_operands = 0 : i64, tpu.core_type = #tpu.core_type<tc>, window_params = [{transform_indices = @transform_0, window_bounds = array<i64: 1, 16, 128>}, {pipeline_mode = #tpu.pipeline_mode<synchronous>, transform_indices = @transform_1, window_bounds = array<i64: 1, 128>}, {pipeline_mode = #tpu.pipeline_mode<synchronous>, transform_indices = @transform_2, window_bounds = array<i64: 1, 128>}, {pipeline_mode = #tpu.pipeline_mode<synchronous>, transform_indices = @transform_3, window_bounds = array<i64: 128, 256>}, {pipeline_mode = #tpu.pipeline_mode<synchronous>, transform_indices = @transform_4, window_bounds = array<i64: 1, 256>}, {pipeline_mode = #tpu.pipeline_mode<synchronous>, transform_indices = @transform_5, window_bounds = array<i64: 256, 128>}, {pipeline_mode = #tpu.pipeline_mode<synchronous>, transform_indices = @transform_6, window_bounds = array<i64: 1, 128>}, {pipeline_mode = #tpu.pipeline_mode<synchronous>, transform_indices = @transform_7, window_bounds = array<i64: 1, 128>}, {pipeline_mode = #tpu.pipeline_mode<synchronous>, transform_indices = @transform_8, window_bounds = array<i64: 1, 128>}, {pipeline_mode = #tpu.pipeline_mode<synchronous>, transform_indices = @transform_9, window_bounds = array<i64: 128, 128>}, {pipeline_mode = #tpu.pipeline_mode<synchronous>, transform_indices = @transform_10, window_bounds = array<i64: 1, 128>}, {pipeline_mode = #tpu.pipeline_mode<synchronous>, transform_indices = @transform_11, window_bounds = array<i64: 128, 128>}, {pipeline_mode = #tpu.pipeline_mode<synchronous>, transform_indices = @transform_12, window_bounds = array<i64: 1, 128>}, {pipeline_mode = #tpu.pipeline_mode<synchronous>, transform_indices = @transform_13, window_bounds = array<i64: 128, 128>}, {pipeline_mode = #tpu.pipeline_mode<synchronous>, transform_indices = @transform_14, window_bounds = array<i64: 1, 128>}, {pipeline_mode = #tpu.pipeline_mode<synchronous>, transform_indices = @transform_15, window_bounds = array<i64: 128, 128>}, {pipeline_mode = #tpu.pipeline_mode<synchronous>, transform_indices = @transform_16, window_bounds = array<i64: 1, 128>}, {pipeline_mode = #tpu.pipeline_mode<synchronous>, transform_indices = @transform_17, window_bounds = array<i64: 1, 128>}, {pipeline_mode = #tpu.pipeline_mode<synchronous>, transform_indices = @transform_18, window_bounds = array<i64: 1, 128>}, {pipeline_mode = #tpu.pipeline_mode<synchronous>, transform_indices = @transform_19, window_bounds = array<i64: 128, 128>}, {pipeline_mode = #tpu.pipeline_mode<synchronous>, transform_indices = @transform_20, window_bounds = array<i64: 128, 128>}, {pipeline_mode = #tpu.pipeline_mode<synchronous>, transform_indices = @transform_21, window_bounds = array<i64: 7, 1, 128>}, {pipeline_mode = #tpu.pipeline_mode<synchronous>, transform_indices = @transform_22, window_bounds = array<i64: 1, 128>}, {pipeline_mode = #tpu.pipeline_mode<synchronous>, transform_indices = @transform_23, window_bounds = array<i64: 1, 128>}, {pipeline_mode = #tpu.pipeline_mode<synchronous>, transform_indices = @transform_24, window_bounds = array<i64: 128, 128>}, {pipeline_mode = #tpu.pipeline_mode<synchronous>, transform_indices = @transform_25, window_bounds = array<i64: 1, 128>}, {pipeline_mode = #tpu.pipeline_mode<synchronous>, transform_indices = @transform_26, window_bounds = array<i64: 1, 128>}, {pipeline_mode = #tpu.pipeline_mode<synchronous>, transform_indices = @transform_27, window_bounds = array<i64: 128, 256>}, {pipeline_mode = #tpu.pipeline_mode<synchronous>, transform_indices = @transform_28, window_bounds = array<i64: 1, 256>}, {pipeline_mode = #tpu.pipeline_mode<synchronous>, transform_indices = @transform_29, window_bounds = array<i64: 256, 128>}, {pipeline_mode = #tpu.pipeline_mode<synchronous>, transform_indices = @transform_30, window_bounds = array<i64: 1, 128>}, {pipeline_mode = #tpu.pipeline_mode<synchronous>, transform_indices = @transform_31, window_bounds = array<i64: 1, 128>}, {pipeline_mode = #tpu.pipeline_mode<synchronous>, transform_indices = @transform_32, window_bounds = array<i64: 1, 128>}, {transform_indices = @transform_33, window_bounds = array<i64: 1, 16, 128>}, {transform_indices = @transform_34, window_bounds = array<i64: 1, 16, 128>}]} {
    %c0 = arith.constant 0 : index
    %c0_0 = arith.constant 0 : index
    %c0_1 = arith.constant 0 : index
    %0 = vector.load %arg1[%c0, %c0_0, %c0_1] : memref<1x16x128xbf16, #tpu.memory_space<vmem>>, vector<1x16x128xbf16>
    %1 = vector.shape_cast %0 : vector<1x16x128xbf16> to vector<16x128xbf16>
    %2 = arith.extf %1 : vector<16x128xbf16> to vector<16x128xf32>
    %c0_2 = arith.constant 0 : index
    %c0_3 = arith.constant 0 : index
    %3 = vector.load %arg2[%c0_2, %c0_3] : memref<1x128xf32, #tpu.memory_space<vmem>>, vector<1x128xf32>
    %c0_4 = arith.constant 0 : index
    %c0_5 = arith.constant 0 : index
    %4 = vector.load %arg3[%c0_4, %c0_5] : memref<1x128xf32, #tpu.memory_space<vmem>>, vector<1x128xf32>
    %cst = arith.constant dense<0.000000e+00> : vector<16xf32>
    %5 = vector.multi_reduction <add>, %2, %cst [1] : vector<16x128xf32> to vector<16xf32>
    %6 = vector.shape_cast %5 : vector<16xf32> to vector<16x1xf32>
    %cst_6 = arith.constant 1.280000e+02 : f32
    %7 = vector.broadcast %cst_6 : f32 to vector<16x1xf32>
    %8 = arith.divf %6, %7 : vector<16x1xf32>
    %9 = vector.broadcast %8 : vector<16x1xf32> to vector<16x128xf32>
    %10 = arith.subf %2, %9 : vector<16x128xf32>
    %11 = arith.mulf %10, %10 : vector<16x128xf32>
    %cst_7 = arith.constant dense<0.000000e+00> : vector<16xf32>
    %12 = vector.multi_reduction <add>, %11, %cst_7 [1] : vector<16x128xf32> to vector<16xf32>
    %13 = vector.shape_cast %12 : vector<16xf32> to vector<16x1xf32>
    %cst_8 = arith.constant 1.280000e+02 : f32
    %14 = vector.broadcast %cst_8 : f32 to vector<16x1xf32>
    %15 = arith.divf %13, %14 : vector<16x1xf32>
    %16 = vector.broadcast %8 : vector<16x1xf32> to vector<16x128xf32>
    %17 = arith.subf %2, %16 : vector<16x128xf32>
    %cst_9 = arith.constant 9.99999974E-6 : f32
    %18 = vector.broadcast %cst_9 : f32 to vector<16x1xf32>
    %19 = arith.addf %15, %18 : vector<16x1xf32>
    %20 = math.rsqrt %19 : vector<16x1xf32>
    %21 = vector.broadcast %20 : vector<16x1xf32> to vector<16x128xf32>
    %22 = arith.mulf %17, %21 : vector<16x128xf32>
    %23 = vector.broadcast %3 : vector<1x128xf32> to vector<16x128xf32>
    %24 = arith.mulf %22, %23 : vector<16x128xf32>
    %25 = vector.broadcast %4 : vector<1x128xf32> to vector<16x128xf32>
    %26 = arith.addf %24, %25 : vector<16x128xf32>
    %c0_10 = arith.constant 0 : index
    %c0_11 = arith.constant 0 : index
    %27 = vector.load %arg4[%c0_10, %c0_11] : memref<128x256xbf16, #tpu.memory_space<vmem>>, vector<128x256xbf16>
    %c0_12 = arith.constant 0 : index
    %c0_13 = arith.constant 0 : index
    %28 = vector.load %arg5[%c0_12, %c0_13] : memref<1x256xf32, #tpu.memory_space<vmem>>, vector<1x256xf32>
    %29 = arith.truncf %26 : vector<16x128xf32> to vector<16x128xbf16>
    %cst_14 = arith.constant dense<0.000000e+00> : vector<16x256xf32>
    %30 = tpu.matmul %29, %27, %cst_14 {dimension_numbers = #tpu.dot_dimension_numbers<[1], [0], [0], [1], [0, 0, 1, 1], [], []>} : vector<16x128xbf16>, vector<128x256xbf16>, vector<16x256xf32> -> vector<16x256xf32>
    %31 = vector.broadcast %28 : vector<1x256xf32> to vector<16x256xf32>
    %32 = arith.addf %30, %31 : vector<16x256xf32>
    %33 = arith.negf %32 : vector<16x256xf32>
    %34 = math.exp %33 : vector<16x256xf32>
    %cst_15 = arith.constant 1.000000e+00 : f32
    %35 = vector.broadcast %cst_15 : f32 to vector<16x256xf32>
    %36 = arith.addf %35, %34 : vector<16x256xf32>
    %37 = arith.divf %35, %36 : vector<16x256xf32>
    %38 = arith.mulf %32, %37 : vector<16x256xf32>
    %c0_16 = arith.constant 0 : index
    %c0_17 = arith.constant 0 : index
    %39 = vector.load %arg6[%c0_16, %c0_17] : memref<256x128xbf16, #tpu.memory_space<vmem>>, vector<256x128xbf16>
    %c0_18 = arith.constant 0 : index
    %c0_19 = arith.constant 0 : index
    %40 = vector.load %arg7[%c0_18, %c0_19] : memref<1x128xf32, #tpu.memory_space<vmem>>, vector<1x128xf32>
    %41 = arith.truncf %38 : vector<16x256xf32> to vector<16x256xbf16>
    %cst_20 = arith.constant dense<0.000000e+00> : vector<16x128xf32>
    %42 = tpu.matmul %41, %39, %cst_20 {dimension_numbers = #tpu.dot_dimension_numbers<[1], [0], [0], [1], [0, 0, 1, 1], [], []>} : vector<16x256xbf16>, vector<256x128xbf16>, vector<16x128xf32> -> vector<16x128xf32>
    %43 = vector.broadcast %40 : vector<1x128xf32> to vector<16x128xf32>
    %44 = arith.addf %42, %43 : vector<16x128xf32>
    %cst_21 = arith.constant 5.000000e-01 : f32
    %45 = vector.broadcast %cst_21 : f32 to vector<16x128xf32>
    %46 = arith.mulf %44, %45 : vector<16x128xf32>
    %47 = arith.addf %46, %2 : vector<16x128xf32>
    %c0_22 = arith.constant 0 : index
    %c0_23 = arith.constant 0 : index
    %48 = vector.load %arg8[%c0_22, %c0_23] : memref<1x128xf32, #tpu.memory_space<vmem>>, vector<1x128xf32>
    %c0_24 = arith.constant 0 : index
    %c0_25 = arith.constant 0 : index
    %49 = vector.load %arg9[%c0_24, %c0_25] : memref<1x128xf32, #tpu.memory_space<vmem>>, vector<1x128xf32>
    %cst_26 = arith.constant dense<0.000000e+00> : vector<16xf32>
    %50 = vector.multi_reduction <add>, %47, %cst_26 [1] : vector<16x128xf32> to vector<16xf32>
    %51 = vector.shape_cast %50 : vector<16xf32> to vector<16x1xf32>
    %cst_27 = arith.constant 1.280000e+02 : f32
    %52 = vector.broadcast %cst_27 : f32 to vector<16x1xf32>
    %53 = arith.divf %51, %52 : vector<16x1xf32>
    %54 = vector.broadcast %53 : vector<16x1xf32> to vector<16x128xf32>
    %55 = arith.subf %47, %54 : vector<16x128xf32>
    %56 = arith.mulf %55, %55 : vector<16x128xf32>
    %cst_28 = arith.constant dense<0.000000e+00> : vector<16xf32>
    %57 = vector.multi_reduction <add>, %56, %cst_28 [1] : vector<16x128xf32> to vector<16xf32>
    %58 = vector.shape_cast %57 : vector<16xf32> to vector<16x1xf32>
    %cst_29 = arith.constant 1.280000e+02 : f32
    %59 = vector.broadcast %cst_29 : f32 to vector<16x1xf32>
    %60 = arith.divf %58, %59 : vector<16x1xf32>
    %61 = vector.broadcast %53 : vector<16x1xf32> to vector<16x128xf32>
    %62 = arith.subf %47, %61 : vector<16x128xf32>
    %cst_30 = arith.constant 9.99999974E-6 : f32
    %63 = vector.broadcast %cst_30 : f32 to vector<16x1xf32>
    %64 = arith.addf %60, %63 : vector<16x1xf32>
    %65 = math.rsqrt %64 : vector<16x1xf32>
    %66 = vector.broadcast %65 : vector<16x1xf32> to vector<16x128xf32>
    %67 = arith.mulf %62, %66 : vector<16x128xf32>
    %68 = vector.broadcast %48 : vector<1x128xf32> to vector<16x128xf32>
    %69 = arith.mulf %67, %68 : vector<16x128xf32>
    %70 = vector.broadcast %49 : vector<1x128xf32> to vector<16x128xf32>
    %71 = arith.addf %69, %70 : vector<16x128xf32>
    %72 = arith.truncf %71 : vector<16x128xf32> to vector<16x128xbf16>
    %c0_31 = arith.constant 0 : index
    %c0_32 = arith.constant 0 : index
    %73 = vector.load %arg10[%c0_31, %c0_32] : memref<128x128xbf16, #tpu.memory_space<vmem>>, vector<128x128xbf16>
    %c0_33 = arith.constant 0 : index
    %c0_34 = arith.constant 0 : index
    %74 = vector.load %arg11[%c0_33, %c0_34] : memref<1x128xf32, #tpu.memory_space<vmem>>, vector<1x128xf32>
    %cst_35 = arith.constant dense<0.000000e+00> : vector<16x128xf32>
    %75 = tpu.matmul %72, %73, %cst_35 {dimension_numbers = #tpu.dot_dimension_numbers<[1], [0], [0], [1], [0, 0, 1, 1], [], []>} : vector<16x128xbf16>, vector<128x128xbf16>, vector<16x128xf32> -> vector<16x128xf32>
    %76 = vector.broadcast %74 : vector<1x128xf32> to vector<16x128xf32>
    %77 = arith.addf %75, %76 : vector<16x128xf32>
    %78 = arith.truncf %77 : vector<16x128xf32> to vector<16x128xbf16>
    %c0_36 = arith.constant 0 : index
    %c0_37 = arith.constant 0 : index
    %79 = vector.load %arg12[%c0_36, %c0_37] : memref<128x128xbf16, #tpu.memory_space<vmem>>, vector<128x128xbf16>
    %c0_38 = arith.constant 0 : index
    %c0_39 = arith.constant 0 : index
    %80 = vector.load %arg13[%c0_38, %c0_39] : memref<1x128xf32, #tpu.memory_space<vmem>>, vector<1x128xf32>
    %cst_40 = arith.constant dense<0.000000e+00> : vector<16x128xf32>
    %81 = tpu.matmul %72, %79, %cst_40 {dimension_numbers = #tpu.dot_dimension_numbers<[1], [0], [0], [1], [0, 0, 1, 1], [], []>} : vector<16x128xbf16>, vector<128x128xbf16>, vector<16x128xf32> -> vector<16x128xf32>
    %82 = vector.broadcast %80 : vector<1x128xf32> to vector<16x128xf32>
    %83 = arith.addf %81, %82 : vector<16x128xf32>
    %84 = arith.truncf %83 : vector<16x128xf32> to vector<16x128xbf16>
    %c0_41 = arith.constant 0 : index
    %c0_42 = arith.constant 0 : index
    %85 = vector.load %arg14[%c0_41, %c0_42] : memref<128x128xbf16, #tpu.memory_space<vmem>>, vector<128x128xbf16>
    %c0_43 = arith.constant 0 : index
    %c0_44 = arith.constant 0 : index
    %86 = vector.load %arg15[%c0_43, %c0_44] : memref<1x128xf32, #tpu.memory_space<vmem>>, vector<1x128xf32>
    %cst_45 = arith.constant dense<0.000000e+00> : vector<16x128xf32>
    %87 = tpu.matmul %72, %85, %cst_45 {dimension_numbers = #tpu.dot_dimension_numbers<[1], [0], [0], [1], [0, 0, 1, 1], [], []>} : vector<16x128xbf16>, vector<128x128xbf16>, vector<16x128xf32> -> vector<16x128xf32>
    %88 = vector.broadcast %86 : vector<1x128xf32> to vector<16x128xf32>
    %89 = arith.addf %87, %88 : vector<16x128xf32>
    %90 = arith.truncf %89 : vector<16x128xf32> to vector<16x128xbf16>
    %91 = vector.extract_strided_slice %78 {offsets = [0, 0], sizes = [16, 32], strides = [1, 1]} : vector<16x128xbf16> to vector<16x32xbf16>
    %92 = vector.extract_strided_slice %78 {offsets = [0, 32], sizes = [16, 32], strides = [1, 1]} : vector<16x128xbf16> to vector<16x32xbf16>
    %93 = vector.extract_strided_slice %78 {offsets = [0, 64], sizes = [16, 32], strides = [1, 1]} : vector<16x128xbf16> to vector<16x32xbf16>
    %94 = vector.extract_strided_slice %78 {offsets = [0, 96], sizes = [16, 32], strides = [1, 1]} : vector<16x128xbf16> to vector<16x32xbf16>
    %95 = vector.shape_cast %91 : vector<16x32xbf16> to vector<1x16x32xbf16>
    %96 = vector.shape_cast %92 : vector<16x32xbf16> to vector<1x16x32xbf16>
    %97 = vector.shape_cast %93 : vector<16x32xbf16> to vector<1x16x32xbf16>
    %98 = vector.shape_cast %94 : vector<16x32xbf16> to vector<1x16x32xbf16>
    %99 = tpu.concatenate %95, %96, %97, %98 in 0 : vector<1x16x32xbf16>, vector<1x16x32xbf16>, vector<1x16x32xbf16>, vector<1x16x32xbf16> -> vector<4x16x32xbf16>
    %100 = vector.extract_strided_slice %84 {offsets = [0, 0], sizes = [16, 32], strides = [1, 1]} : vector<16x128xbf16> to vector<16x32xbf16>
    %101 = vector.extract_strided_slice %84 {offsets = [0, 32], sizes = [16, 32], strides = [1, 1]} : vector<16x128xbf16> to vector<16x32xbf16>
    %102 = vector.extract_strided_slice %84 {offsets = [0, 64], sizes = [16, 32], strides = [1, 1]} : vector<16x128xbf16> to vector<16x32xbf16>
    %103 = vector.extract_strided_slice %84 {offsets = [0, 96], sizes = [16, 32], strides = [1, 1]} : vector<16x128xbf16> to vector<16x32xbf16>
    %104 = vector.shape_cast %100 : vector<16x32xbf16> to vector<1x16x32xbf16>
    %105 = vector.shape_cast %101 : vector<16x32xbf16> to vector<1x16x32xbf16>
    %106 = vector.shape_cast %102 : vector<16x32xbf16> to vector<1x16x32xbf16>
    %107 = vector.shape_cast %103 : vector<16x32xbf16> to vector<1x16x32xbf16>
    %108 = tpu.concatenate %104, %105, %106, %107 in 0 : vector<1x16x32xbf16>, vector<1x16x32xbf16>, vector<1x16x32xbf16>, vector<1x16x32xbf16> -> vector<4x16x32xbf16>
    %109 = vector.extract_strided_slice %90 {offsets = [0, 0], sizes = [16, 32], strides = [1, 1]} : vector<16x128xbf16> to vector<16x32xbf16>
    %110 = vector.extract_strided_slice %90 {offsets = [0, 32], sizes = [16, 32], strides = [1, 1]} : vector<16x128xbf16> to vector<16x32xbf16>
    %111 = vector.extract_strided_slice %90 {offsets = [0, 64], sizes = [16, 32], strides = [1, 1]} : vector<16x128xbf16> to vector<16x32xbf16>
    %112 = vector.extract_strided_slice %90 {offsets = [0, 96], sizes = [16, 32], strides = [1, 1]} : vector<16x128xbf16> to vector<16x32xbf16>
    %113 = vector.shape_cast %109 : vector<16x32xbf16> to vector<1x16x32xbf16>
    %114 = vector.shape_cast %110 : vector<16x32xbf16> to vector<1x16x32xbf16>
    %115 = vector.shape_cast %111 : vector<16x32xbf16> to vector<1x16x32xbf16>
    %116 = vector.shape_cast %112 : vector<16x32xbf16> to vector<1x16x32xbf16>
    %117 = tpu.concatenate %113, %114, %115, %116 in 0 : vector<1x16x32xbf16>, vector<1x16x32xbf16>, vector<1x16x32xbf16>, vector<1x16x32xbf16> -> vector<4x16x32xbf16>
    "tpu.trace_start"() <{level = 10 : i32, message = "htd,hsd->hts"}> : () -> ()
    %cst_46 = arith.constant dense<0.000000e+00> : vector<4x16x16xf32>
    %118 = tpu.matmul %99, %108, %cst_46 {dimension_numbers = #tpu.dot_dimension_numbers<[2], [2], [1], [1], [0, 0, 0, 1, 1, 1], [0], [0]>} : vector<4x16x32xbf16>, vector<4x16x32xbf16>, vector<4x16x16xf32> -> vector<4x16x16xf32>
    "tpu.trace_stop"() : () -> ()
    %cst_47 = arith.constant dense<0xFF800000> : vector<4x16xf32>
    %119 = vector.multi_reduction <maximumf>, %118, %cst_47 [2] : vector<4x16x16xf32> to vector<4x16xf32>
    %120 = vector.shape_cast %119 : vector<4x16xf32> to vector<4x16x1xf32>
    %121 = vector.broadcast %120 : vector<4x16x1xf32> to vector<4x16x16xf32>
    %122 = arith.subf %118, %121 : vector<4x16x16xf32>
    %123 = math.exp %122 : vector<4x16x16xf32>
    %cst_48 = arith.constant dense<0.000000e+00> : vector<4x16xf32>
    %124 = vector.multi_reduction <add>, %123, %cst_48 [2] : vector<4x16x16xf32> to vector<4x16xf32>
    %125 = vector.shape_cast %124 : vector<4x16xf32> to vector<4x16x1xf32>
    %126 = tpu.reciprocal %125 {approx = true} : vector<4x16x1xf32> -> vector<4x16x1xf32>
    %127 = vector.broadcast %126 : vector<4x16x1xf32> to vector<4x16x16xf32>
    %128 = arith.mulf %123, %127 : vector<4x16x16xf32>
    %129 = arith.truncf %128 : vector<4x16x16xf32> to vector<4x16x16xbf16>
    "tpu.trace_start"() <{level = 10 : i32, message = "hts,hsd->htd"}> : () -> ()
    %cst_49 = arith.constant dense<0.000000e+00> : vector<4x16x32xf32>
    %130 = tpu.matmul %129, %117, %cst_49 {dimension_numbers = #tpu.dot_dimension_numbers<[2], [1], [1], [2], [0, 0, 0, 1, 1, 2], [0], [0]>} : vector<4x16x16xbf16>, vector<4x16x32xbf16>, vector<4x16x32xf32> -> vector<4x16x32xf32>
    "tpu.trace_stop"() : () -> ()
    %131 = vector.extract_strided_slice %130 {offsets = [0, 0, 0], sizes = [1, 16, 32], strides = [1, 1, 1]} : vector<4x16x32xf32> to vector<1x16x32xf32>
    %132 = vector.shape_cast %131 : vector<1x16x32xf32> to vector<16x32xf32>
    %133 = vector.extract_strided_slice %130 {offsets = [1, 0, 0], sizes = [1, 16, 32], strides = [1, 1, 1]} : vector<4x16x32xf32> to vector<1x16x32xf32>
    %134 = vector.shape_cast %133 : vector<1x16x32xf32> to vector<16x32xf32>
    %135 = vector.extract_strided_slice %130 {offsets = [2, 0, 0], sizes = [1, 16, 32], strides = [1, 1, 1]} : vector<4x16x32xf32> to vector<1x16x32xf32>
    %136 = vector.shape_cast %135 : vector<1x16x32xf32> to vector<16x32xf32>
    %137 = vector.extract_strided_slice %130 {offsets = [3, 0, 0], sizes = [1, 16, 32], strides = [1, 1, 1]} : vector<4x16x32xf32> to vector<1x16x32xf32>
    %138 = vector.shape_cast %137 : vector<1x16x32xf32> to vector<16x32xf32>
    %139 = tpu.concatenate %132, %134, %136, %138 in 1 : vector<16x32xf32>, vector<16x32xf32>, vector<16x32xf32>, vector<16x32xf32> -> vector<16x128xf32>
    %c0_50 = arith.constant 0 : index
    %c0_51 = arith.constant 0 : index
    %140 = vector.load %arg16[%c0_50, %c0_51] : memref<128x128xbf16, #tpu.memory_space<vmem>>, vector<128x128xbf16>
    %c0_52 = arith.constant 0 : index
    %c0_53 = arith.constant 0 : index
    %141 = vector.load %arg17[%c0_52, %c0_53] : memref<1x128xf32, #tpu.memory_space<vmem>>, vector<1x128xf32>
    %142 = arith.truncf %139 : vector<16x128xf32> to vector<16x128xbf16>
    %cst_54 = arith.constant dense<0.000000e+00> : vector<16x128xf32>
    %143 = tpu.matmul %142, %140, %cst_54 {dimension_numbers = #tpu.dot_dimension_numbers<[1], [0], [0], [1], [0, 0, 1, 1], [], []>} : vector<16x128xbf16>, vector<128x128xbf16>, vector<16x128xf32> -> vector<16x128xf32>
    %144 = vector.broadcast %141 : vector<1x128xf32> to vector<16x128xf32>
    %145 = arith.addf %143, %144 : vector<16x128xf32>
    %146 = arith.addf %145, %47 : vector<16x128xf32>
    %c0_55 = arith.constant 0 : index
    %c0_56 = arith.constant 0 : index
    %147 = vector.load %arg18[%c0_55, %c0_56] : memref<1x128xf32, #tpu.memory_space<vmem>>, vector<1x128xf32>
    %c0_57 = arith.constant 0 : index
    %c0_58 = arith.constant 0 : index
    %148 = vector.load %arg19[%c0_57, %c0_58] : memref<1x128xf32, #tpu.memory_space<vmem>>, vector<1x128xf32>
    %cst_59 = arith.constant dense<0.000000e+00> : vector<16xf32>
    %149 = vector.multi_reduction <add>, %146, %cst_59 [1] : vector<16x128xf32> to vector<16xf32>
    %150 = vector.shape_cast %149 : vector<16xf32> to vector<16x1xf32>
    %cst_60 = arith.constant 1.280000e+02 : f32
    %151 = vector.broadcast %cst_60 : f32 to vector<16x1xf32>
    %152 = arith.divf %150, %151 : vector<16x1xf32>
    %153 = vector.broadcast %152 : vector<16x1xf32> to vector<16x128xf32>
    %154 = arith.subf %146, %153 : vector<16x128xf32>
    %155 = arith.mulf %154, %154 : vector<16x128xf32>
    %cst_61 = arith.constant dense<0.000000e+00> : vector<16xf32>
    %156 = vector.multi_reduction <add>, %155, %cst_61 [1] : vector<16x128xf32> to vector<16xf32>
    %157 = vector.shape_cast %156 : vector<16xf32> to vector<16x1xf32>
    %cst_62 = arith.constant 1.280000e+02 : f32
    %158 = vector.broadcast %cst_62 : f32 to vector<16x1xf32>
    %159 = arith.divf %157, %158 : vector<16x1xf32>
    %160 = vector.broadcast %152 : vector<16x1xf32> to vector<16x128xf32>
    %161 = arith.subf %146, %160 : vector<16x128xf32>
    %cst_63 = arith.constant 9.99999974E-6 : f32
    %162 = vector.broadcast %cst_63 : f32 to vector<16x1xf32>
    %163 = arith.addf %159, %162 : vector<16x1xf32>
    %164 = math.rsqrt %163 : vector<16x1xf32>
    %165 = vector.broadcast %164 : vector<16x1xf32> to vector<16x128xf32>
    %166 = arith.mulf %161, %165 : vector<16x128xf32>
    %167 = vector.broadcast %147 : vector<1x128xf32> to vector<16x128xf32>
    %168 = arith.mulf %166, %167 : vector<16x128xf32>
    %169 = vector.broadcast %148 : vector<1x128xf32> to vector<16x128xf32>
    %170 = arith.addf %168, %169 : vector<16x128xf32>
    %171 = arith.truncf %170 : vector<16x128xf32> to vector<16x128xbf16>
    %c0_64 = arith.constant 0 : index
    %c0_65 = arith.constant 0 : index
    %172 = vector.load %arg20[%c0_64, %c0_65] : memref<128x128xbf16, #tpu.memory_space<vmem>>, vector<128x128xbf16>
    %cst_66 = arith.constant dense<0.000000e+00> : vector<16x128xf32>
    %173 = tpu.matmul %171, %172, %cst_66 {dimension_numbers = #tpu.dot_dimension_numbers<[1], [0], [0], [1], [0, 0, 1, 1], [], []>} : vector<16x128xbf16>, vector<128x128xbf16>, vector<16x128xf32> -> vector<16x128xf32>
    %c0_67 = arith.constant 0 : index
    %c0_68 = arith.constant 0 : index
    %174 = vector.load %arg21[%c0_67, %c0_68] : memref<128x128xbf16, #tpu.memory_space<vmem>>, vector<128x128xbf16>
    %cst_69 = arith.constant dense<0.000000e+00> : vector<16x128xf32>
    %175 = tpu.matmul %171, %174, %cst_69 {dimension_numbers = #tpu.dot_dimension_numbers<[1], [0], [0], [1], [0, 0, 1, 1], [], []>} : vector<16x128xbf16>, vector<128x128xbf16>, vector<16x128xf32> -> vector<16x128xf32>
    %176 = arith.negf %175 : vector<16x128xf32>
    %177 = math.exp %176 : vector<16x128xf32>
    %cst_70 = arith.constant 1.000000e+00 : f32
    %178 = vector.broadcast %cst_70 : f32 to vector<16x128xf32>
    %179 = arith.addf %178, %177 : vector<16x128xf32>
    %180 = arith.divf %178, %179 : vector<16x128xf32>
    %181 = arith.mulf %173, %180 : vector<16x128xf32>
    %182 = tpu.iota {dimensions = array<i32: 0>} : vector<16x1xi32>
    %c0_71 = arith.constant 0 : index
    %c0_72 = arith.constant 0 : index
    %c0_73 = arith.constant 0 : index
    %183 = vector.load %arg22[%c0_71, %c0_72, %c0_73] : memref<7x1x128xf32, #tpu.memory_space<vmem>>, vector<7x1x128xf32>
    %cst_74 = arith.constant 0.000000e+00 : f32
    %184 = vector.broadcast %cst_74 : f32 to vector<16x128xf32>
    %c3_i32 = arith.constant 3 : i32
    %185 = tpu.dynamic_rotate %181 by %c3_i32 dim 0 : vector<16x128xf32>, i32 -> vector<16x128xf32>
    %c3_i32_75 = arith.constant 3 : i32
    %186 = vector.broadcast %c3_i32_75 : i32 to vector<16x1xi32>
    %187 = arith.cmpi sge, %182, %186 : vector<16x1xi32>
    %cst_76 = arith.constant 0.000000e+00 : f32
    %188 = vector.shape_cast %187 : vector<16x1xi1> to vector<16x1xi1>
    %189 = vector.broadcast %188 : vector<16x1xi1> to vector<16x128xi1>
    %190 = vector.broadcast %cst_76 : f32 to vector<16x128xf32>
    %191 = arith.select %189, %185, %190 : vector<16x128xi1>, vector<16x128xf32>
    %192 = vector.extract_strided_slice %183 {offsets = [0, 0, 0], sizes = [1, 1, 128], strides = [1, 1, 1]} : vector<7x1x128xf32> to vector<1x1x128xf32>
    %193 = vector.shape_cast %192 : vector<1x1x128xf32> to vector<1x128xf32>
    %194 = vector.broadcast %193 : vector<1x128xf32> to vector<16x128xf32>
    %195 = arith.mulf %191, %194 : vector<16x128xf32>
    %196 = arith.addf %184, %195 : vector<16x128xf32>
    %c2_i32 = arith.constant 2 : i32
    %197 = tpu.dynamic_rotate %181 by %c2_i32 dim 0 : vector<16x128xf32>, i32 -> vector<16x128xf32>
    %c2_i32_77 = arith.constant 2 : i32
    %198 = vector.broadcast %c2_i32_77 : i32 to vector<16x1xi32>
    %199 = arith.cmpi sge, %182, %198 : vector<16x1xi32>
    %cst_78 = arith.constant 0.000000e+00 : f32
    %200 = vector.shape_cast %199 : vector<16x1xi1> to vector<16x1xi1>
    %201 = vector.broadcast %200 : vector<16x1xi1> to vector<16x128xi1>
    %202 = vector.broadcast %cst_78 : f32 to vector<16x128xf32>
    %203 = arith.select %201, %197, %202 : vector<16x128xi1>, vector<16x128xf32>
    %204 = vector.extract_strided_slice %183 {offsets = [1, 0, 0], sizes = [1, 1, 128], strides = [1, 1, 1]} : vector<7x1x128xf32> to vector<1x1x128xf32>
    %205 = vector.shape_cast %204 : vector<1x1x128xf32> to vector<1x128xf32>
    %206 = vector.broadcast %205 : vector<1x128xf32> to vector<16x128xf32>
    %207 = arith.mulf %203, %206 : vector<16x128xf32>
    %208 = arith.addf %196, %207 : vector<16x128xf32>
    %c1_i32 = arith.constant 1 : i32
    %209 = tpu.dynamic_rotate %181 by %c1_i32 dim 0 : vector<16x128xf32>, i32 -> vector<16x128xf32>
    %c1_i32_79 = arith.constant 1 : i32
    %210 = vector.broadcast %c1_i32_79 : i32 to vector<16x1xi32>
    %211 = arith.cmpi sge, %182, %210 : vector<16x1xi32>
    %cst_80 = arith.constant 0.000000e+00 : f32
    %212 = vector.shape_cast %211 : vector<16x1xi1> to vector<16x1xi1>
    %213 = vector.broadcast %212 : vector<16x1xi1> to vector<16x128xi1>
    %214 = vector.broadcast %cst_80 : f32 to vector<16x128xf32>
    %215 = arith.select %213, %209, %214 : vector<16x128xi1>, vector<16x128xf32>
    %216 = vector.extract_strided_slice %183 {offsets = [2, 0, 0], sizes = [1, 1, 128], strides = [1, 1, 1]} : vector<7x1x128xf32> to vector<1x1x128xf32>
    %217 = vector.shape_cast %216 : vector<1x1x128xf32> to vector<1x128xf32>
    %218 = vector.broadcast %217 : vector<1x128xf32> to vector<16x128xf32>
    %219 = arith.mulf %215, %218 : vector<16x128xf32>
    %220 = arith.addf %208, %219 : vector<16x128xf32>
    %221 = vector.extract_strided_slice %183 {offsets = [3, 0, 0], sizes = [1, 1, 128], strides = [1, 1, 1]} : vector<7x1x128xf32> to vector<1x1x128xf32>
    %222 = vector.shape_cast %221 : vector<1x1x128xf32> to vector<1x128xf32>
    %223 = vector.broadcast %222 : vector<1x128xf32> to vector<16x128xf32>
    %224 = arith.mulf %181, %223 : vector<16x128xf32>
    %225 = arith.addf %220, %224 : vector<16x128xf32>
    %c15_i32 = arith.constant 15 : i32
    %226 = tpu.dynamic_rotate %181 by %c15_i32 dim 0 : vector<16x128xf32>, i32 -> vector<16x128xf32>
    %c15_i32_81 = arith.constant 15 : i32
    %227 = vector.broadcast %c15_i32_81 : i32 to vector<16x1xi32>
    %228 = arith.cmpi slt, %182, %227 : vector<16x1xi32>
    %cst_82 = arith.constant 0.000000e+00 : f32
    %229 = vector.shape_cast %228 : vector<16x1xi1> to vector<16x1xi1>
    %230 = vector.broadcast %229 : vector<16x1xi1> to vector<16x128xi1>
    %231 = vector.broadcast %cst_82 : f32 to vector<16x128xf32>
    %232 = arith.select %230, %226, %231 : vector<16x128xi1>, vector<16x128xf32>
    %233 = vector.extract_strided_slice %183 {offsets = [4, 0, 0], sizes = [1, 1, 128], strides = [1, 1, 1]} : vector<7x1x128xf32> to vector<1x1x128xf32>
    %234 = vector.shape_cast %233 : vector<1x1x128xf32> to vector<1x128xf32>
    %235 = vector.broadcast %234 : vector<1x128xf32> to vector<16x128xf32>
    %236 = arith.mulf %232, %235 : vector<16x128xf32>
    %237 = arith.addf %225, %236 : vector<16x128xf32>
    %c14_i32 = arith.constant 14 : i32
    %238 = tpu.dynamic_rotate %181 by %c14_i32 dim 0 : vector<16x128xf32>, i32 -> vector<16x128xf32>
    %c14_i32_83 = arith.constant 14 : i32
    %239 = vector.broadcast %c14_i32_83 : i32 to vector<16x1xi32>
    %240 = arith.cmpi slt, %182, %239 : vector<16x1xi32>
    %cst_84 = arith.constant 0.000000e+00 : f32
    %241 = vector.shape_cast %240 : vector<16x1xi1> to vector<16x1xi1>
    %242 = vector.broadcast %241 : vector<16x1xi1> to vector<16x128xi1>
    %243 = vector.broadcast %cst_84 : f32 to vector<16x128xf32>
    %244 = arith.select %242, %238, %243 : vector<16x128xi1>, vector<16x128xf32>
    %245 = vector.extract_strided_slice %183 {offsets = [5, 0, 0], sizes = [1, 1, 128], strides = [1, 1, 1]} : vector<7x1x128xf32> to vector<1x1x128xf32>
    %246 = vector.shape_cast %245 : vector<1x1x128xf32> to vector<1x128xf32>
    %247 = vector.broadcast %246 : vector<1x128xf32> to vector<16x128xf32>
    %248 = arith.mulf %244, %247 : vector<16x128xf32>
    %249 = arith.addf %237, %248 : vector<16x128xf32>
    %c13_i32 = arith.constant 13 : i32
    %250 = tpu.dynamic_rotate %181 by %c13_i32 dim 0 : vector<16x128xf32>, i32 -> vector<16x128xf32>
    %c13_i32_85 = arith.constant 13 : i32
    %251 = vector.broadcast %c13_i32_85 : i32 to vector<16x1xi32>
    %252 = arith.cmpi slt, %182, %251 : vector<16x1xi32>
    %cst_86 = arith.constant 0.000000e+00 : f32
    %253 = vector.shape_cast %252 : vector<16x1xi1> to vector<16x1xi1>
    %254 = vector.broadcast %253 : vector<16x1xi1> to vector<16x128xi1>
    %255 = vector.broadcast %cst_86 : f32 to vector<16x128xf32>
    %256 = arith.select %254, %250, %255 : vector<16x128xi1>, vector<16x128xf32>
    %257 = vector.extract_strided_slice %183 {offsets = [6, 0, 0], sizes = [1, 1, 128], strides = [1, 1, 1]} : vector<7x1x128xf32> to vector<1x1x128xf32>
    %258 = vector.shape_cast %257 : vector<1x1x128xf32> to vector<1x128xf32>
    %259 = vector.broadcast %258 : vector<1x128xf32> to vector<16x128xf32>
    %260 = arith.mulf %256, %259 : vector<16x128xf32>
    %261 = arith.addf %249, %260 : vector<16x128xf32>
    %c0_87 = arith.constant 0 : index
    %c0_88 = arith.constant 0 : index
    %262 = vector.load %arg23[%c0_87, %c0_88] : memref<1x128xf32, #tpu.memory_space<vmem>>, vector<1x128xf32>
    %263 = vector.broadcast %262 : vector<1x128xf32> to vector<16x128xf32>
    %264 = arith.mulf %261, %263 : vector<16x128xf32>
    %c0_89 = arith.constant 0 : index
    %c0_90 = arith.constant 0 : index
    %265 = vector.load %arg24[%c0_89, %c0_90] : memref<1x128xf32, #tpu.memory_space<vmem>>, vector<1x128xf32>
    %266 = vector.broadcast %265 : vector<1x128xf32> to vector<16x128xf32>
    %267 = arith.addf %264, %266 : vector<16x128xf32>
    %268 = arith.negf %267 : vector<16x128xf32>
    %269 = math.exp %268 : vector<16x128xf32>
    %cst_91 = arith.constant 1.000000e+00 : f32
    %270 = vector.broadcast %cst_91 : f32 to vector<16x128xf32>
    %271 = arith.addf %270, %269 : vector<16x128xf32>
    %272 = arith.divf %270, %271 : vector<16x128xf32>
    %273 = arith.mulf %267, %272 : vector<16x128xf32>
    %c0_92 = arith.constant 0 : index
    %c0_93 = arith.constant 0 : index
    %274 = vector.load %arg25[%c0_92, %c0_93] : memref<128x128xbf16, #tpu.memory_space<vmem>>, vector<128x128xbf16>
    %275 = arith.truncf %273 : vector<16x128xf32> to vector<16x128xbf16>
    %cst_94 = arith.constant dense<0.000000e+00> : vector<16x128xf32>
    %276 = tpu.matmul %275, %274, %cst_94 {dimension_numbers = #tpu.dot_dimension_numbers<[1], [0], [0], [1], [0, 0, 1, 1], [], []>} : vector<16x128xbf16>, vector<128x128xbf16>, vector<16x128xf32> -> vector<16x128xf32>
    %277 = arith.addf %276, %146 : vector<16x128xf32>
    %c0_95 = arith.constant 0 : index
    %c0_96 = arith.constant 0 : index
    %278 = vector.load %arg26[%c0_95, %c0_96] : memref<1x128xf32, #tpu.memory_space<vmem>>, vector<1x128xf32>
    %c0_97 = arith.constant 0 : index
    %c0_98 = arith.constant 0 : index
    %279 = vector.load %arg27[%c0_97, %c0_98] : memref<1x128xf32, #tpu.memory_space<vmem>>, vector<1x128xf32>
    %cst_99 = arith.constant dense<0.000000e+00> : vector<16xf32>
    %280 = vector.multi_reduction <add>, %277, %cst_99 [1] : vector<16x128xf32> to vector<16xf32>
    %281 = vector.shape_cast %280 : vector<16xf32> to vector<16x1xf32>
    %cst_100 = arith.constant 1.280000e+02 : f32
    %282 = vector.broadcast %cst_100 : f32 to vector<16x1xf32>
    %283 = arith.divf %281, %282 : vector<16x1xf32>
    %284 = vector.broadcast %283 : vector<16x1xf32> to vector<16x128xf32>
    %285 = arith.subf %277, %284 : vector<16x128xf32>
    %286 = arith.mulf %285, %285 : vector<16x128xf32>
    %cst_101 = arith.constant dense<0.000000e+00> : vector<16xf32>
    %287 = vector.multi_reduction <add>, %286, %cst_101 [1] : vector<16x128xf32> to vector<16xf32>
    %288 = vector.shape_cast %287 : vector<16xf32> to vector<16x1xf32>
    %cst_102 = arith.constant 1.280000e+02 : f32
    %289 = vector.broadcast %cst_102 : f32 to vector<16x1xf32>
    %290 = arith.divf %288, %289 : vector<16x1xf32>
    %291 = vector.broadcast %283 : vector<16x1xf32> to vector<16x128xf32>
    %292 = arith.subf %277, %291 : vector<16x128xf32>
    %cst_103 = arith.constant 9.99999974E-6 : f32
    %293 = vector.broadcast %cst_103 : f32 to vector<16x1xf32>
    %294 = arith.addf %290, %293 : vector<16x1xf32>
    %295 = math.rsqrt %294 : vector<16x1xf32>
    %296 = vector.broadcast %295 : vector<16x1xf32> to vector<16x128xf32>
    %297 = arith.mulf %292, %296 : vector<16x128xf32>
    %298 = vector.broadcast %278 : vector<1x128xf32> to vector<16x128xf32>
    %299 = arith.mulf %297, %298 : vector<16x128xf32>
    %300 = vector.broadcast %279 : vector<1x128xf32> to vector<16x128xf32>
    %301 = arith.addf %299, %300 : vector<16x128xf32>
    %c0_104 = arith.constant 0 : index
    %c0_105 = arith.constant 0 : index
    %302 = vector.load %arg28[%c0_104, %c0_105] : memref<128x256xbf16, #tpu.memory_space<vmem>>, vector<128x256xbf16>
    %c0_106 = arith.constant 0 : index
    %c0_107 = arith.constant 0 : index
    %303 = vector.load %arg29[%c0_106, %c0_107] : memref<1x256xf32, #tpu.memory_space<vmem>>, vector<1x256xf32>
    %304 = arith.truncf %301 : vector<16x128xf32> to vector<16x128xbf16>
    %cst_108 = arith.constant dense<0.000000e+00> : vector<16x256xf32>
    %305 = tpu.matmul %304, %302, %cst_108 {dimension_numbers = #tpu.dot_dimension_numbers<[1], [0], [0], [1], [0, 0, 1, 1], [], []>} : vector<16x128xbf16>, vector<128x256xbf16>, vector<16x256xf32> -> vector<16x256xf32>
    %306 = vector.broadcast %303 : vector<1x256xf32> to vector<16x256xf32>
    %307 = arith.addf %305, %306 : vector<16x256xf32>
    %308 = arith.negf %307 : vector<16x256xf32>
    %309 = math.exp %308 : vector<16x256xf32>
    %cst_109 = arith.constant 1.000000e+00 : f32
    %310 = vector.broadcast %cst_109 : f32 to vector<16x256xf32>
    %311 = arith.addf %310, %309 : vector<16x256xf32>
    %312 = arith.divf %310, %311 : vector<16x256xf32>
    %313 = arith.mulf %307, %312 : vector<16x256xf32>
    %c0_110 = arith.constant 0 : index
    %c0_111 = arith.constant 0 : index
    %314 = vector.load %arg30[%c0_110, %c0_111] : memref<256x128xbf16, #tpu.memory_space<vmem>>, vector<256x128xbf16>
    %c0_112 = arith.constant 0 : index
    %c0_113 = arith.constant 0 : index
    %315 = vector.load %arg31[%c0_112, %c0_113] : memref<1x128xf32, #tpu.memory_space<vmem>>, vector<1x128xf32>
    %316 = arith.truncf %313 : vector<16x256xf32> to vector<16x256xbf16>
    %cst_114 = arith.constant dense<0.000000e+00> : vector<16x128xf32>
    %317 = tpu.matmul %316, %314, %cst_114 {dimension_numbers = #tpu.dot_dimension_numbers<[1], [0], [0], [1], [0, 0, 1, 1], [], []>} : vector<16x256xbf16>, vector<256x128xbf16>, vector<16x128xf32> -> vector<16x128xf32>
    %318 = vector.broadcast %315 : vector<1x128xf32> to vector<16x128xf32>
    %319 = arith.addf %317, %318 : vector<16x128xf32>
    %cst_115 = arith.constant 5.000000e-01 : f32
    %320 = vector.broadcast %cst_115 : f32 to vector<16x128xf32>
    %321 = arith.mulf %319, %320 : vector<16x128xf32>
    %322 = arith.addf %321, %277 : vector<16x128xf32>
    %c0_116 = arith.constant 0 : index
    %c0_117 = arith.constant 0 : index
    %323 = vector.load %arg32[%c0_116, %c0_117] : memref<1x128xf32, #tpu.memory_space<vmem>>, vector<1x128xf32>
    %c0_118 = arith.constant 0 : index
    %c0_119 = arith.constant 0 : index
    %324 = vector.load %arg33[%c0_118, %c0_119] : memref<1x128xf32, #tpu.memory_space<vmem>>, vector<1x128xf32>
    %cst_120 = arith.constant dense<0.000000e+00> : vector<16xf32>
    %325 = vector.multi_reduction <add>, %322, %cst_120 [1] : vector<16x128xf32> to vector<16xf32>
    %326 = vector.shape_cast %325 : vector<16xf32> to vector<16x1xf32>
    %cst_121 = arith.constant 1.280000e+02 : f32
    %327 = vector.broadcast %cst_121 : f32 to vector<16x1xf32>
    %328 = arith.divf %326, %327 : vector<16x1xf32>
    %329 = vector.broadcast %328 : vector<16x1xf32> to vector<16x128xf32>
    %330 = arith.subf %322, %329 : vector<16x128xf32>
    %331 = arith.mulf %330, %330 : vector<16x128xf32>
    %cst_122 = arith.constant dense<0.000000e+00> : vector<16xf32>
    %332 = vector.multi_reduction <add>, %331, %cst_122 [1] : vector<16x128xf32> to vector<16xf32>
    %333 = vector.shape_cast %332 : vector<16xf32> to vector<16x1xf32>
    %cst_123 = arith.constant 1.280000e+02 : f32
    %334 = vector.broadcast %cst_123 : f32 to vector<16x1xf32>
    %335 = arith.divf %333, %334 : vector<16x1xf32>
    %336 = vector.broadcast %328 : vector<16x1xf32> to vector<16x128xf32>
    %337 = arith.subf %322, %336 : vector<16x128xf32>
    %cst_124 = arith.constant 9.99999974E-6 : f32
    %338 = vector.broadcast %cst_124 : f32 to vector<16x1xf32>
    %339 = arith.addf %335, %338 : vector<16x1xf32>
    %340 = math.rsqrt %339 : vector<16x1xf32>
    %341 = vector.broadcast %340 : vector<16x1xf32> to vector<16x128xf32>
    %342 = arith.mulf %337, %341 : vector<16x128xf32>
    %343 = vector.broadcast %323 : vector<1x128xf32> to vector<16x128xf32>
    %344 = arith.mulf %342, %343 : vector<16x128xf32>
    %345 = vector.broadcast %324 : vector<1x128xf32> to vector<16x128xf32>
    %346 = arith.addf %344, %345 : vector<16x128xf32>
    %347 = arith.truncf %346 : vector<16x128xf32> to vector<16x128xbf16>
    %c0_125 = arith.constant 0 : index
    %c0_126 = arith.constant 0 : index
    %c0_127 = arith.constant 0 : index
    %348 = vector.load %arg34[%c0_125, %c0_126, %c0_127] : memref<1x16x128xbf16, #tpu.memory_space<vmem>>, vector<1x16x128xbf16>
    %349 = vector.shape_cast %348 : vector<1x16x128xbf16> to vector<16x128xbf16>
    %350 = vector.shape_cast %347 : vector<16x128xbf16> to vector<1x16x128xbf16>
    tpu.vector_store %arg34[%c0_125, %c0_126, %c0_127], %350 {strides = array<i32>} : memref<1x16x128xbf16, #tpu.memory_space<vmem>>, vector<1x16x128xbf16>,
    %351 = arith.truncf %319 : vector<16x128xf32> to vector<16x128xbf16>
    %c0_128 = arith.constant 0 : index
    %c0_129 = arith.constant 0 : index
    %c0_130 = arith.constant 0 : index
    %352 = vector.load %arg35[%c0_128, %c0_129, %c0_130] : memref<1x16x128xbf16, #tpu.memory_space<vmem>>, vector<1x16x128xbf16>
    %353 = vector.shape_cast %352 : vector<1x16x128xbf16> to vector<16x128xbf16>
    %354 = vector.shape_cast %351 : vector<16x128xbf16> to vector<1x16x128xbf16>
    tpu.vector_store %arg35[%c0_128, %c0_129, %c0_130], %354 {strides = array<i32>} : memref<1x16x128xbf16, #tpu.memory_space<vmem>>, vector<1x16x128xbf16>,
    return
  }
  func.func @transform_0(%arg0: i32) -> (i32, i32, i32) {
    %c0_i32 = arith.constant 0 : i32
    %c0_i32_0 = arith.constant 0 : i32
    %c0_i32_1 = arith.constant 0 : i32
    return %arg0, %c0_i32, %c0_i32_0 : i32, i32, i32
  }
  func.func @transform_1(%arg0: i32) -> (i32, i32) {
    %c0_i32 = arith.constant 0 : i32
    %c0_i32_0 = arith.constant 0 : i32
    %c0_i32_1 = arith.constant 0 : i32
    return %c0_i32, %c0_i32_0 : i32, i32
  }
  func.func @transform_2(%arg0: i32) -> (i32, i32) {
    %c0_i32 = arith.constant 0 : i32
    %c0_i32_0 = arith.constant 0 : i32
    %c0_i32_1 = arith.constant 0 : i32
    return %c0_i32, %c0_i32_0 : i32, i32
  }
  func.func @transform_3(%arg0: i32) -> (i32, i32) {
    %c0_i32 = arith.constant 0 : i32
    %c0_i32_0 = arith.constant 0 : i32
    %c0_i32_1 = arith.constant 0 : i32
    return %c0_i32, %c0_i32_0 : i32, i32
  }
  func.func @transform_4(%arg0: i32) -> (i32, i32) {
    %c0_i32 = arith.constant 0 : i32
    %c0_i32_0 = arith.constant 0 : i32
    %c0_i32_1 = arith.constant 0 : i32
    return %c0_i32, %c0_i32_0 : i32, i32
  }
  func.func @transform_5(%arg0: i32) -> (i32, i32) {
    %c0_i32 = arith.constant 0 : i32
    %c0_i32_0 = arith.constant 0 : i32
    %c0_i32_1 = arith.constant 0 : i32
    return %c0_i32, %c0_i32_0 : i32, i32
  }
  func.func @transform_6(%arg0: i32) -> (i32, i32) {
    %c0_i32 = arith.constant 0 : i32
    %c0_i32_0 = arith.constant 0 : i32
    %c0_i32_1 = arith.constant 0 : i32
    return %c0_i32, %c0_i32_0 : i32, i32
  }
  func.func @transform_7(%arg0: i32) -> (i32, i32) {
    %c0_i32 = arith.constant 0 : i32
    %c0_i32_0 = arith.constant 0 : i32
    %c0_i32_1 = arith.constant 0 : i32
    return %c0_i32, %c0_i32_0 : i32, i32
  }
  func.func @transform_8(%arg0: i32) -> (i32, i32) {
    %c0_i32 = arith.constant 0 : i32
    %c0_i32_0 = arith.constant 0 : i32
    %c0_i32_1 = arith.constant 0 : i32
    return %c0_i32, %c0_i32_0 : i32, i32
  }
  func.func @transform_9(%arg0: i32) -> (i32, i32) {
    %c0_i32 = arith.constant 0 : i32
    %c0_i32_0 = arith.constant 0 : i32
    %c0_i32_1 = arith.constant 0 : i32
    return %c0_i32, %c0_i32_0 : i32, i32
  }
  func.func @transform_10(%arg0: i32) -> (i32, i32) {
    %c0_i32 = arith.constant 0 : i32
    %c0_i32_0 = arith.constant 0 : i32
    %c0_i32_1 = arith.constant 0 : i32
    return %c0_i32, %c0_i32_0 : i32, i32
  }
  func.func @transform_11(%arg0: i32) -> (i32, i32) {
    %c0_i32 = arith.constant 0 : i32
    %c0_i32_0 = arith.constant 0 : i32
    %c0_i32_1 = arith.constant 0 : i32
    return %c0_i32, %c0_i32_0 : i32, i32
  }
  func.func @transform_12(%arg0: i32) -> (i32, i32) {
    %c0_i32 = arith.constant 0 : i32
    %c0_i32_0 = arith.constant 0 : i32
    %c0_i32_1 = arith.constant 0 : i32
    return %c0_i32, %c0_i32_0 : i32, i32
  }
  func.func @transform_13(%arg0: i32) -> (i32, i32) {
    %c0_i32 = arith.constant 0 : i32
    %c0_i32_0 = arith.constant 0 : i32
    %c0_i32_1 = arith.constant 0 : i32
    return %c0_i32, %c0_i32_0 : i32, i32
  }
  func.func @transform_14(%arg0: i32) -> (i32, i32) {
    %c0_i32 = arith.constant 0 : i32
    %c0_i32_0 = arith.constant 0 : i32
    %c0_i32_1 = arith.constant 0 : i32
    return %c0_i32, %c0_i32_0 : i32, i32
  }
  func.func @transform_15(%arg0: i32) -> (i32, i32) {
    %c0_i32 = arith.constant 0 : i32
    %c0_i32_0 = arith.constant 0 : i32
    %c0_i32_1 = arith.constant 0 : i32
    return %c0_i32, %c0_i32_0 : i32, i32
  }
  func.func @transform_16(%arg0: i32) -> (i32, i32) {
    %c0_i32 = arith.constant 0 : i32
    %c0_i32_0 = arith.constant 0 : i32
    %c0_i32_1 = arith.constant 0 : i32
    return %c0_i32, %c0_i32_0 : i32, i32
  }
  func.func @transform_17(%arg0: i32) -> (i32, i32) {
    %c0_i32 = arith.constant 0 : i32
    %c0_i32_0 = arith.constant 0 : i32
    %c0_i32_1 = arith.constant 0 : i32
    return %c0_i32, %c0_i32_0 : i32, i32
  }
  func.func @transform_18(%arg0: i32) -> (i32, i32) {
    %c0_i32 = arith.constant 0 : i32
    %c0_i32_0 = arith.constant 0 : i32
    %c0_i32_1 = arith.constant 0 : i32
    return %c0_i32, %c0_i32_0 : i32, i32
  }
  func.func @transform_19(%arg0: i32) -> (i32, i32) {
    %c0_i32 = arith.constant 0 : i32
    %c0_i32_0 = arith.constant 0 : i32
    %c0_i32_1 = arith.constant 0 : i32
    return %c0_i32, %c0_i32_0 : i32, i32
  }
  func.func @transform_20(%arg0: i32) -> (i32, i32) {
    %c0_i32 = arith.constant 0 : i32
    %c0_i32_0 = arith.constant 0 : i32
    %c0_i32_1 = arith.constant 0 : i32
    return %c0_i32, %c0_i32_0 : i32, i32
  }
  func.func @transform_21(%arg0: i32) -> (i32, i32, i32) {
    %c0_i32 = arith.constant 0 : i32
    %c0_i32_0 = arith.constant 0 : i32
    %c0_i32_1 = arith.constant 0 : i32
    %c0_i32_2 = arith.constant 0 : i32
    return %c0_i32, %c0_i32_0, %c0_i32_1 : i32, i32, i32
  }
  func.func @transform_22(%arg0: i32) -> (i32, i32) {
    %c0_i32 = arith.constant 0 : i32
    %c0_i32_0 = arith.constant 0 : i32
    %c0_i32_1 = arith.constant 0 : i32
    return %c0_i32, %c0_i32_0 : i32, i32
  }
  func.func @transform_23(%arg0: i32) -> (i32, i32) {
    %c0_i32 = arith.constant 0 : i32
    %c0_i32_0 = arith.constant 0 : i32
    %c0_i32_1 = arith.constant 0 : i32
    return %c0_i32, %c0_i32_0 : i32, i32
  }
  func.func @transform_24(%arg0: i32) -> (i32, i32) {
    %c0_i32 = arith.constant 0 : i32
    %c0_i32_0 = arith.constant 0 : i32
    %c0_i32_1 = arith.constant 0 : i32
    return %c0_i32, %c0_i32_0 : i32, i32
  }
  func.func @transform_25(%arg0: i32) -> (i32, i32) {
    %c0_i32 = arith.constant 0 : i32
    %c0_i32_0 = arith.constant 0 : i32
    %c0_i32_1 = arith.constant 0 : i32
    return %c0_i32, %c0_i32_0 : i32, i32
  }
  func.func @transform_26(%arg0: i32) -> (i32, i32) {
    %c0_i32 = arith.constant 0 : i32
    %c0_i32_0 = arith.constant 0 : i32
    %c0_i32_1 = arith.constant 0 : i32
    return %c0_i32, %c0_i32_0 : i32, i32
  }
  func.func @transform_27(%arg0: i32) -> (i32, i32) {
    %c0_i32 = arith.constant 0 : i32
    %c0_i32_0 = arith.constant 0 : i32
    %c0_i32_1 = arith.constant 0 : i32
    return %c0_i32, %c0_i32_0 : i32, i32
  }
  func.func @transform_28(%arg0: i32) -> (i32, i32) {
    %c0_i32 = arith.constant 0 : i32
    %c0_i32_0 = arith.constant 0 : i32
    %c0_i32_1 = arith.constant 0 : i32
    return %c0_i32, %c0_i32_0 : i32, i32
  }
  func.func @transform_29(%arg0: i32) -> (i32, i32) {
    %c0_i32 = arith.constant 0 : i32
    %c0_i32_0 = arith.constant 0 : i32
    %c0_i32_1 = arith.constant 0 : i32
    return %c0_i32, %c0_i32_0 : i32, i32
  }
  func.func @transform_30(%arg0: i32) -> (i32, i32) {
    %c0_i32 = arith.constant 0 : i32
    %c0_i32_0 = arith.constant 0 : i32
    %c0_i32_1 = arith.constant 0 : i32
    return %c0_i32, %c0_i32_0 : i32, i32
  }
  func.func @transform_31(%arg0: i32) -> (i32, i32) {
    %c0_i32 = arith.constant 0 : i32
    %c0_i32_0 = arith.constant 0 : i32
    %c0_i32_1 = arith.constant 0 : i32
    return %c0_i32, %c0_i32_0 : i32, i32
  }
  func.func @transform_32(%arg0: i32) -> (i32, i32) {
    %c0_i32 = arith.constant 0 : i32
    %c0_i32_0 = arith.constant 0 : i32
    %c0_i32_1 = arith.constant 0 : i32
    return %c0_i32, %c0_i32_0 : i32, i32
  }
  func.func @transform_33(%arg0: i32) -> (i32, i32, i32) {
    %c0_i32 = arith.constant 0 : i32
    %c0_i32_0 = arith.constant 0 : i32
    %c0_i32_1 = arith.constant 0 : i32
    return %arg0, %c0_i32, %c0_i32_0 : i32, i32, i32
  }
  func.func @transform_34(%arg0: i32) -> (i32, i32, i32) {
    %c0_i32 = arith.constant 0 : i32
    %c0_i32_0 = arith.constant 0 : i32
    %c0_i32_1 = arith.constant 0 : i32
    return %arg0, %c0_i32, %c0_i32_0 : i32, i32, i32
  }
}

</mosaic_0001>

<bundles_post_ra>
// kernel: conformer_layer.1
= control target key start
LH: loop header
LB: loop body
LE: loop exit
PB: predicated region body
PF: predicated region fallthrough
CT: control target
= control target key end

     0   :  { %s4604_s6 = smov 1   ;;  %s4605_s10 = smov 2   ;;  %s5371_s0 = inlined_call_operand.smem [shape: u32[35], index: -1, kind: input, shape index: {}] }
   0x1   :  { %s4655_s5 = sld [smem:[%s5371_s0]]   ;;  %s4606_s14 = smov 3  }
   0x2   :  { %s4660_s9 = sld [smem:[%s5371_s0 + %s4604_s6]]   ;;  %s4607_s18 = smov 4  }
   0x3   :  { %s4665_s13 = sld [smem:[%s5371_s0 + %s4605_s10]]   ;;  %s4608_s22 = smov 5  }
   0x4   :  { %s4670_s17 = sld [smem:[%s5371_s0 + %s4606_s14]]   ;;  %s4609_s26 = smov 6  }
   0x5   :  { %s4675_s21 = sld [smem:[%s5371_s0 + %s4607_s18]]   ;;  %s4610_s30 = smov 7  }
   0x6   :  { %s4680_s25 = sld [smem:[%s5371_s0 + %s4608_s22]]   ;;  %s4611_s4 = smov 8  }
   0x7   :  { %5392 = sst [smem:[#allocation8_spill]] %s4655_s5  ;;  %s4612_s10 = smov 9  }
   0x8   :  { %5393 = sst [smem:[#allocation9_spill]] %s4660_s9  ;;  %s4613_s15 = smov 10  }
   0x9   :  { %5394 = sst [smem:[#allocation10_spill]] %s4665_s13  ;;  %s4614_s20 = smov 11  }
   0xa   :  { %s4685_s29 = sld [smem:[%s5371_s0 + %s4609_s26]]   ;;  %s4615_s26 = smov 12  }
   0xb   :  { %s4690_s3 = sld [smem:[%s5371_s0 + %s4610_s30]]   ;;  %s4616_s1 = smov 13  }
   0xc   :  { %s4695_s8 = sld [smem:[%s5371_s0 + %s4611_s4]]   ;;  %s4617_s7 = smov 14  }
   0xd   :  { %s4700_s14 = sld [smem:[%s5371_s0 + %s4612_s10]]   ;;  %s4619_s22 = smov 16  }
   0xe   :  { %s4705_s19 = sld [smem:[%s5371_s0 + %s4613_s15]]   ;;  %s4618_s15 = smov 15  }
   0xf   :  { %s4710_s24 = sld [smem:[%s5371_s0 + %s4614_s20]]   ;;  %s4620_s28 = smov 17  }
  0x10   :  { %s4715_s30 = sld [smem:[%s5371_s0 + %s4615_s26]]  }
  0x11   :  { %5395 = sst [smem:[#allocation11_spill]] %s4690_s3 }
  0x12   :  { %5396 = sst [smem:[#allocation12_spill]] %s4695_s8 }
  0x13   :  { %5397 = sst [smem:[#allocation13_spill]] %s4700_s14 }
  0x14   :  { %s4720_s6 = sld [smem:[%s5371_s0 + %s4616_s1]]  }
  0x15   :  { %s4725_s12 = sld [smem:[%s5371_s0 + %s4617_s7]]   ;;  %s4621_s7 = smov 18  }
  0x16   :  { %s4730_s20 = sld [smem:[%s5371_s0 + %s4618_s15]]   ;;  %s4622_s15 = smov 19  }
  0x17   :  { %s4735_s27 = sld [smem:[%s5371_s0 + %s4619_s22]]   ;;  %s4623_s22 = smov 20  }
  0x18   :  { %s4740_s4 = sld [smem:[%s5371_s0 + %s4620_s28]]   ;;  %s4624_s28 = smov 21  }
  0x1a   :  { %5398 = sst [smem:[#allocation14_spill]] %s4720_s6 }
  0x1b   :  { %5399 = sst [smem:[#allocation15_spill]] %s4725_s12 }
  0x1c   :  { %5400 = sst [smem:[#allocation16_spill]] %s4730_s20 }
  0x1d   :  { %5401 = sst [smem:[#allocation17_spill]] %s4735_s27 }
  0x1e   :  { %5402 = sst [smem:[#allocation18_spill]] %s4740_s4 }
  0x1f   :  { %s4745_s12 = sld [smem:[%s5371_s0 + %s4621_s7]]   ;;  %s4625_s7 = smov 22  }
  0x20   :  { %s4750_s20 = sld [smem:[%s5371_s0 + %s4622_s15]]   ;;  %s4626_s15 = smov 23  }
  0x21   :  { %s4755_s27 = sld [smem:[%s5371_s0 + %s4623_s22]]   ;;  %s4627_s22 = smov 24  }
  0x22   :  { %s4760_s4 = sld [smem:[%s5371_s0 + %s4624_s28]]   ;;  %s4628_s28 = smov 25  }
  0x25   :  { %5403 = sst [smem:[#allocation19_spill]] %s4745_s12 }
  0x26   :  { %5404 = sst [smem:[#allocation20_spill]] %s4750_s20 }
  0x27   :  { %5405 = sst [smem:[#allocation21_spill]] %s4755_s27 }
  0x28   :  { %5406 = sst [smem:[#allocation22_spill]] %s4760_s4 }
  0x29   :  { %s4765_s12 = sld [smem:[%s5371_s0 + %s4625_s7]]   ;;  %s4629_s7 = smov 26  }
  0x2a   :  { %s4770_s20 = sld [smem:[%s5371_s0 + %s4626_s15]]   ;;  %s4630_s15 = smov 27  }
  0x2b   :  { %s4775_s27 = sld [smem:[%s5371_s0 + %s4627_s22]]   ;;  %s4631_s22 = smov 28  }
  0x2c   :  { %s4780_s4 = sld [smem:[%s5371_s0 + %s4628_s28]]   ;;  %s4632_s28 = smov 29  }
  0x2f   :  { %5407 = sst [smem:[#allocation23_spill]] %s4765_s12 }
  0x30   :  { %5408 = sst [smem:[#allocation24_spill]] %s4770_s20 }
  0x31   :  { %5409 = sst [smem:[#allocation25_spill]] %s4775_s27 }
  0x32   :  { %5410 = sst [smem:[#allocation26_spill]] %s4780_s4 }
  0x33   :  { %s4785_s12 = sld [smem:[%s5371_s0 + %s4629_s7]]   ;;  %s4633_s7 = smov 30  }
  0x34   :  { %s4790_s20 = sld [smem:[%s5371_s0 + %s4630_s15]]   ;;  %s4634_s15 = smov 31  }
  0x35   :  { %s4795_s27 = sld [smem:[%s5371_s0 + %s4631_s22]]   ;;  %s4635_s22 = smov 32  }
  0x36   :  { %s4800_s4 = sld [smem:[%s5371_s0 + %s4632_s28]]   ;;  %s4636_s28 = smov 33  }
  0x39   :  { %5411 = sst [smem:[#allocation27_spill]] %s4785_s12 }
  0x3a   :  { %5412 = sst [smem:[#allocation28_spill]] %s4790_s20 }
  0x3b   :  { %5413 = sst [smem:[#allocation29_spill]] %s4795_s27 }
  0x3c   :  { %5414 = sst [smem:[#allocation30_spill]] %s4800_s4 }
  0x3d   :  { %s4805_s12 = sld [smem:[%s5371_s0 + %s4633_s7]]   ;;  %s4637_s7 = smov 34  }
  0x3e   :  { %s4810_s20 = sld [smem:[%s5371_s0 + %s4634_s15]]  }
  0x3f   :  { %s4815_s27 = sld [smem:[%s5371_s0 + %s4635_s22]]  }
  0x40   :  { %s4820_s4 = sld [smem:[%s5371_s0 + %s4636_s28]]  }
  0x43   :  { %5415 = sst [smem:[#allocation31_spill]] %s4805_s12 }
  0x44   :  { %s4825_s12 = sld [smem:[%s5371_s0 + %s4637_s7]]  }
  0x4a   :  { %5416 = sst [smem:[#allocation32_spill]] %s4825_s12 }
  0x4b   :  { %75 = vsyncpa [#allocation3], 0 }
  0x4c   :  { %77 = vsyncpa [#allocation3 + $0x1], 0 }
  0x4d   :  { %78 = vsyncpa [#allocation5], 0 }
  0x4e   :  { %80 = vsyncpa [#allocation5 + $0x1], 0  ;;  %s4827_s15 = smov 0   ;;  %s4829_s16 = smov 0  }
  0x4f   :  { %s4831_s18 = smov 0   ;;  %s4833_s22 = smov 0  }
  0x50 LB: > { %s5417_s12 = sld [smem:[#allocation32_spill]]  ;;  %s5418_s14 = sld [smem:[#allocation13_spill]]  ;;  %s4598_s18 = sphi %s4831_s18, %s5449_s18   ;;  %s4594_s16 = sphi %s4829_s16, %s5448_s16   ;;  %s4590_s15 = sphi %s4827_s15, %s5447_s15   ;;  %s4602_s22 = sphi %s4833_s22, %s5450_s22  }
  0x51   : > { %s5419_s6 = sld [smem:[#allocation14_spill]]  ;;  %s4848_s0 = sadd.s32 4294967295, %s4602_s22  }
  0x52   : > { %s3655_s23 = sadd.s32 4294967294, %s4602_s22   ;;  %s4852_s26 = sadd.s32 1, %s4602_s22  }
  0x53   : > { %s791_s28 = sadd.s32 1, %s4598_s18  ;;  %s788_s1 = ssub.s32 %s4602_s22, %s4852_s26 }
  0x54   : > { %p801_p0 = scmp.ne.s32.totalorder %s4598_s18, %s4594_s16  ;;  %p789_p1 = scmp.eq.s32.totalorder %s788_s1, 0 }
  0x55   : > { %p802_p2 = scmp.eq.s32.totalorder %s4848_s0, 1  ;;  %p807_p3 = scmp.ne.s32.totalorder %s4594_s16, %s4590_s15 }
  0x56   : > { %p808_p4 = scmp.eq.s32.totalorder %s3655_s23, 1  ;;  %p3658_p7 = scmp.ge.s32.totalorder %s4602_s22, 1 }
  0x57   : > { %s4863_s2 = scalar_select %p789_p1, %s4598_s18, %s791_s28  }
  0x58   : > { %p4865_p5 = por %p802_p2, %p801_p0  ;;  %p4869_p6 = por %p808_p4, %p807_p3 }
  0x59   : > { %p956_p8 = scmp.lt.s32.totalorder %s4602_s22, 3 }
  0x5b   : > { %p957_p9 = pnand %p3658_p7, %p956_p8 }
  0x5c   : > { %s5422_s5 = sld [smem:[#allocation8_spill]] (!%p957_p9)  ;;  %p1047_p10 = scmp.lt.s32.totalorder (!%p957_p9), %s4848_s0, 1  ;;  %v4272_v3 = vld [vmem:[%s4670_s17 + $0x4] ss:$8 sps:$4 sm:$0xff] (!%p957_p9)   ;;  %v4274_v4 = vld [vmem:[%s4670_s17] ss:$8 sps:$4 sm:$0xff] (!%p957_p9)   ;;  %v1117_v61 = vlaneseq (!%p957_p9) }
  0x5d   : > { %960 = sbr.rel (%p957_p9) target bundleno = 4631 (0x1217), region = 152  ;;  %v4275_v5 = vld [vmem:[%s4670_s17 + $0x14] ss:$8 sps:$4 sm:$0xff] (!%p957_p9)   ;;  %1207 = vmatprep.subr.bf16.mxu0 (!%p957_p9), %v4272_v3  ;;  %v4277_v14 = vld [vmem:[%s4670_s17 + $0x10] ss:$8 sps:$4 sm:$0xff] (!%p957_p9)   ;;  %v4638_v22 = vmov (!%p957_p9), 0  }
  0x5e   : > { %1208 = vmatpush1.bf16.msra.mxu0 (!%p957_p9), %v4274_v4  ;;  %v4278_v15 = vld [vmem:[%s4670_s17 + $0x24] ss:$8 sps:$4 sm:$0xff] (!%p957_p9)   ;;  %v4280_v16 = vld [vmem:[%s4670_s17 + $0x20] ss:$8 sps:$4 sm:$0xff] (!%p957_p9)   ;;  %v4281_v17 = vld [vmem:[%s4670_s17 + $0x34] ss:$8 sps:$4 sm:$0xff] (!%p957_p9)   ;;  %1239 = vmatprep.mubr.bf16.mxu0 (!%p957_p9), %v4638_v22 }
  0x5f   : > { %1209 = vmatprep.subr.bf16.mxu0 (!%p957_p9), %v4275_v5  ;;  %v4283_v18 = vld [vmem:[%s4670_s17 + $0x30] ss:$8 sps:$4 sm:$0xff] (!%p957_p9)   ;;  %v4284_v19 = vld [vmem:[%s4670_s17 + $0x44] ss:$8 sps:$4 sm:$0xff] (!%p957_p9)   ;;  %v4286_v20 = vld [vmem:[%s4670_s17 + $0x40] ss:$8 sps:$4 sm:$0xff] (!%p957_p9)  }
  0x60   : > { %v4287_v21 = vld [vmem:[%s4670_s17 + $0x54] ss:$8 sps:$4 sm:$0xff] (!%p957_p9)   ;;  %v4289_v23 = vld [vmem:[%s4670_s17 + $0x50] ss:$8 sps:$4 sm:$0xff] (!%p957_p9)   ;;  %v4290_v24 = vld [vmem:[%s4670_s17 + $0x64] ss:$8 sps:$4 sm:$0xff] (!%p957_p9)  }
  0x61   : > { %v4292_v25 = vld [vmem:[%s4670_s17 + $0x60] ss:$8 sps:$4 sm:$0xff] (!%p957_p9)   ;;  %s5423_s9 = sld [smem:[#allocation9_spill]] (!%p957_p9)  ;;  %v4293_v26 = vld [vmem:[%s4670_s17 + $0x74] ss:$8 sps:$4 sm:$0xff] (!%p957_p9)   ;;  %s5424_s13 = sld [smem:[#allocation10_spill]] (!%p957_p9) }
  0x62   : > { %1210 = vmatpush1.bf16.msra.mxu0 (!%p957_p9), %v4277_v14  ;;  %v4295_v27 = vld [vmem:[%s4670_s17 + $0x70] ss:$8 sps:$4 sm:$0xff] (!%p957_p9)   ;;  %v4296_v45 = vld [vmem:[%s4680_s25 + $0x40] sm:$0xff] (!%p957_p9)   ;;  %v4298_v47 = vld [vmem:[%s4680_s25 + $0x48] sm:$0xff] (!%p957_p9)   ;;  %v4921_v62 = vshrl.u32 (!%p957_p9), %v1117_v61, 7  ;;  %vm4640_vm0 = vmmov (!%p957_p9), 0  }
  0x63   : > { %1211 = vmatprep.subr.bf16.mxu0 (!%p957_p9), %v4278_v15  ;;  %v4297_v46 = vld [vmem:[%s4680_s25] sm:$0xff] (!%p957_p9)   ;;  %3861 = vmatprep.subr.bf16.mxu1 (!%p957_p9), %v4296_v45  ;;  %v4299_v48 = vld [vmem:[%s4680_s25 + $0x8] sm:$0xff] (!%p957_p9)   ;;  %v4300_v49 = vld [vmem:[%s4680_s25 + $0x50] sm:$0xff] (!%p957_p9)   ;;  %s5425_s3 = sld [smem:[#allocation11_spill]] (!%p957_p9)  ;;  %s5426_s8 = sld [smem:[#allocation12_spill]] (!%p957_p9)  ;;  %vm1864_vm1 = vcmask (!%p957_p9), 261120  }
  0x64   : > { %s1048_s11 = scalar_select %p1047_p10, %s4848_s0, 1  ;;  %3862 = vmatpush3.bf16.msra.mxu1 %v4297_v46  ;;  %v4301_v50 = vld [vmem:[%s4680_s25 + $0x10] sm:$0xff]   ;;  %v4302_v51 = vld [vmem:[%s4680_s25 + $0x58] sm:$0xff]   ;;  %v4304_v53 = vld [vmem:[%s4680_s25 + $0x60] sm:$0xff]   ;;  %v1119_v63 = vsub.s32 0, %v4921_v62  ;;  %v1123_v3 = vsub.s32 1, %v4921_v62 }
  0x65   : > { %3863 = vmatprep.subr.bf16.mxu1 %v4298_v47  ;;  %v4303_v52 = vld [vmem:[%s4680_s25 + $0x18] sm:$0xff]   ;;  %v4305_v54 = vld [vmem:[%s4680_s25 + $0x20] sm:$0xff]   ;;  %v4306_v55 = vld [vmem:[%s4680_s25 + $0x68] sm:$0xff]   ;;  %s5427_s1 = sld [smem:[#allocation15_spill]]  ;;  %vm2053_vm2 = vcmask 130048   ;;  %vm2348_vm3 = vcmask 523264  }
  0x66   : > { %s3840_s23 = sshll.u32 %s1048_s11, 3  ;;  %1212 = vmatpush1.bf16.msra.mxu0 %v4280_v16  ;;  %v4307_v56 = vld [vmem:[%s4680_s25 + $0x28] sm:$0xff]   ;;  %v4308_v57 = vld [vmem:[%s4680_s25 + $0x70] sm:$0xff]   ;;  %v4310_v59 = vld [vmem:[%s4680_s25 + $0x78] sm:$0xff]   ;;  %s4641_s11 = smov 96   ;;  %vm2351_vm4 = vcmask 785408  }
  0x67   : > { %s1051_s28 = scalar_lea.vmem %s5422_s5, %s3840_s23  ;;  %1213 = vmatprep.subr.bf16.mxu0 %v4281_v17  ;;  %v3663_v36 = vld [vmem:[%s5423_s9] ss:$0 sm:$0xff]  ;;  %v4309_v58 = vld [vmem:[%s4680_s25 + $0x30] sm:$0xff]   ;;  %v4311_v60 = vld [vmem:[%s4680_s25 + $0x38] sm:$0xff]   ;;  %s4642_s23 = smov 32   ;;  %vm2746_vm5 = vcmp.lt.s32.totalorder %v4921_v62, 3 }
  0x68   : > { %v3848_v0 = vld [vmem:[%s1051_s28] sm:$0xff]   ;;  %3864 = vmatpush3.bf16.msra.mxu1 %v4299_v48  ;;  %v4316_v61 = vld [vmem:[%s5418_s14 + $0x10] sm:$0xff]   ;;  %s5379_s28 = smov 64   ;;  %vm2749_vm6 = vcmp.ge.s32.totalorder %v4921_v62, 3  ;;  %vm2769_vm7 = vcmp.lt.s32.totalorder %v4921_v62, 2  ;;  %vm2772_vm8 = vcmp.ge.s32.totalorder %v4921_v62, 2 }
  0x69   : > { %v4878_v1 = vunpack.c.l.bf16 %v3848_v0  ;;  %v4881_v2 = vunpack.c.h.bf16 %v3848_v0  ;;  %v3664_v40 = vld [vmem:[%s5424_s13] ss:$0 sm:$0xff]  ;;  %3865 = vmatprep.subr.bf16.mxu1 %v4300_v49  ;;  %vm2792_vm9 = vcmp.lt.s32.totalorder %v4921_v62, 1  ;;  %vm2795_vm10 = vcmp.ge.s32.totalorder %v4921_v62, 1  ;;  %s5441_s5 = sld [smem:[#allocation30_spill]] }
  0x6a   : > { %1214 = vmatpush1.bf16.msra.mxu0 %v4283_v18  ;;  %v1114_v0 = vld [vmem:[%s4675_s21] sm:$0x3]  ;;  %vm2825_vm11 = vcmp.lt.s32.totalorder %v4921_v62, 7  ;;  %vm2848_vm12 = vcmp.lt.s32.totalorder %v4921_v62, 6  ;;  %vm2871_vm15 = vcmp.lt.s32.totalorder %v4921_v62, 5 }
  0x6b   : > { %1059 = vadd.xlane.f32.xlu0 %v4878_v1  ;;  %1215 = vmatprep.subr.bf16.mxu0 %v4284_v19  ;;  %v1120_v4 = vrot.slane %v1114_v0, %v1119_v63  ;;  %v1124_v5 = vrot.slane %v1114_v0, %v1123_v3  ;;  %v4317_v0 = vld [vmem:[%s4710_s24 + $0x10] sm:$0xff]  }
  0x6c   : > { %3866 = vmatpush3.bf16.msra.mxu1 %v4301_v50  ;;  %v4312_v50 = vld [vmem:[%s5418_s14] sm:$0xff]  }
  0x6d   : > { %3867 = vmatprep.subr.bf16.mxu1 %v4302_v51  ;;  %v4313_v51 = vld [vmem:[%s4710_s24] sm:$0xff]  }
  0x6e   : > { %1216 = vmatpush1.bf16.msra.mxu0 %v4286_v20 }
  0x6f   : > { %1061 = vadd.xlane.f32.xlu0 %v4881_v2  ;;  %1217 = vmatprep.subr.bf16.mxu0 %v4287_v21 }
  0x70   : > { %3868 = vmatpush3.bf16.msra.mxu1 %v4303_v52  ;;  %v4639_v52 = vmov 0.0  }
  0x71   : > { %3869 = vmatprep.subr.bf16.mxu1 %v4304_v53  ;;  %v4314_v53 = vld [vmem:[%s5418_s14 + $0x8] sm:$0xff]  }
  0x72   : > { %1218 = vmatpush1.bf16.msra.mxu0 %v4289_v23 }
  0x73   : > { %1219 = vmatprep.subr.bf16.mxu0 %v4290_v24 }
  0x74   : > { %3870 = vmatpush3.bf16.msra.mxu1 %v4305_v54  ;;  %v4315_v54 = vld [vmem:[%s4710_s24 + $0x8] sm:$0xff]  }
  0x75   : > { %3871 = vmatprep.subr.bf16.mxu1 %v4306_v55 }
  0x76   : > { %1220 = vmatpush1.bf16.msra.mxu0 %v4292_v25 }
  0x77   : > { %1221 = vmatprep.subr.bf16.mxu0 %v4293_v26 }
  0x78   : > { %3872 = vmatpush3.bf16.msra.mxu1 %v4307_v56 }
  0x79   : > { %3873 = vmatprep.subr.bf16.mxu1 %v4308_v57 }
  0x7a   : > { %1222 = vmatpush1.bf16.msra.mxu0 %v4295_v27 }
  0x7b   : > { %3984 = vmatprep.subr.bf16.mxu0 %v4639_v52 }
  0x7c   : > { %3874 = vmatpush3.bf16.msra.mxu1 %v4309_v58 }
  0x7d   : > { %3875 = vmatprep.subr.bf16.mxu1 %v4310_v59 }
  0x80   : > { %3876 = vmatpush3.bf16.msra.mxu1 %v4311_v60 }
  0x81   : > { %4004 = vmatprep.subr.bf16.mxu1 %v4639_v52 }
  0xf8   : > { %v1060_v6 = vpop.xlane.xlu0 %1059 }
  0xf9   : > { %v1064_v7 = vmul.f32 0.0078125, %v1060_v6 }
  0xfb   : > { %v1066_v8 = vsub.f32 %v4878_v1, %v1064_v7 }
  0xfc   : > { %v1062_v9 = vpop.xlane.xlu0 %1061 }
  0xfd   : > { %v1065_v10 = vmul.f32 0.0078125, %v1062_v9  ;;  %v1068_v11 = vmul.f32 %v1066_v8, %v1066_v8 }
  0xff   : > { %v1067_v12 = vsub.f32 %v4881_v2, %v1065_v10  ;;  %1070 = vadd.xlane.f32.xlu1 %v1068_v11 }
 0x101   : > { %v1069_v13 = vmul.f32 %v1067_v12, %v1067_v12 }
 0x103   : > { %1072 = vadd.xlane.f32.xlu1 %v1069_v13 }
 0x18c   : > { %v1071_v28 = vpop.xlane.xlu1 %1070 }
 0x18d   : > { %v1074_v29 = vmul.f32 0.0078125, %v1071_v28 }
 0x18f   : > { %v1076_v30 = vadd.f32 1e-05, %v1074_v29 }
 0x190   : > { %v1073_v31 = vpop.xlane.xlu1 %1072 }
 0x191   : > { %4408 = vrsqrt.f32 %v1076_v30  ;;  %v1075_v32 = vmul.f32 0.0078125, %v1073_v31 }
 0x193   : > { %v1077_v33 = vadd.f32 1e-05, %v1075_v32 }
 0x195   : > { %4410 = vrsqrt.f32 %v1077_v33 }
 0x19b   : > { %v4409_v34 = vpop.eup %4408 }
 0x19c   : > { %v1080_v35 = vmul.f32 %v4409_v34, %v1066_v8 }
 0x19e   : > { %v1088_v39 = vmul.f32 %v3663_v36, %v1080_v35 }
 0x19f   : > { %v4411_v37 = vpop.eup %4410 }
 0x1a0   : > { %v1081_v38 = vmul.f32 %v4411_v37, %v1067_v12  ;;  %v1096_v42 = vadd.f32 %v3664_v40, %v1088_v39 }
 0x1a2   : > { %v1089_v41 = vmul.f32 %v3663_v36, %v1081_v38  ;;  %v3685_v38 = vld [vmem:[%s4685_s29] ss:$0 sm:$0xff] }
 0x1a4   : > { %v1097_v43 = vadd.f32 %v3664_v40, %v1089_v41 }
 0x1a6   : > { %v1115_v44 = vpack.c.bf16 %v1097_v43, %v1096_v42 }
 0x1a8   : > { %1240 = vmatmul.mubr.bf16.vlgmr.msra.gmra.mrb[0].mxu0 %v1115_v44 }
 0x1a9   : > { %3985 = vmatpush3.bf16.msra.mxu0 %v4312_v50  ;;  %4000 = vmatprep.mubr.msk.bf16.mxu0 %vm4640_vm0, %v4639_v52 }
 0x1aa   : > { %3986 = vmatprep.subr.bf16.mxu0 %v4639_v52 }
 0x1ad   : > { %3987 = vmatpush3.bf16.msra.mxu0 %v4314_v53 }
 0x1ae   : > { %3988 = vmatprep.subr.bf16.mxu0 %v4639_v52 }
 0x1b1   : > { %3989 = vmatpush3.bf16.msra.mxu0 %v4316_v61 }
 0x1b2   : > { %3990 = vmatprep.subr.bf16.mxu0 %v4639_v52 }
 0x27b   : > { %v1241_v6 = vpop.f32.mrb[0].mxu0 }
 0x27c   : > { %v1242_v7 = vadd.f32 %v1241_v6, %v1120_v4  ;;  %v1243_v8 = vpop.f32.mrb[1].mxu0  ;;  %v4320_v6 = vld [vmem:[%s5418_s14 + $0x20] sm:$0xff]  }
 0x27d   : > { %v1244_v9 = vadd.f32 %v1243_v8, %v1124_v5  ;;  %v1245_v10 = vpop.f32.mrb[2].mxu0  ;;  %v4322_v8 = vld [vmem:[%s5418_s14 + $0x28] sm:$0xff]  }
 0x27e   : > { %v3681_v11 = vmul.f32 -1.442695, %v1242_v7  ;;  %v1246_v12 = vadd.f32 %v1245_v10, %v1120_v4  ;;  %v1247_v13 = vpop.f32.mrb[3].mxu0  ;;  %v4318_v4 = vld [vmem:[%s5418_s14 + $0x18] sm:$0xff]   ;;  %v4324_v10 = vld [vmem:[%s5418_s14 + $0x30] sm:$0xff]  }
 0x27f   : > { %v3682_v14 = vmul.f32 -1.442695, %v1244_v9  ;;  %v1248_v15 = vadd.f32 %v1247_v13, %v1124_v5  ;;  %v4319_v5 = vld [vmem:[%s4710_s24 + $0x18] sm:$0xff]   ;;  %3991 = vmatpush3.bf16.msra.mxu0 %v4318_v4 }
 0x280   : > { %4412 = vpow2.f32 %v3681_v11  ;;  %v3683_v16 = vmul.f32 -1.442695, %v1246_v12  ;;  %3992 = vmatprep.subr.bf16.mxu0 %v4639_v52  ;;  %v4325_v11 = vld [vmem:[%s4710_s24 + $0x30] sm:$0xff]   ;;  %v4327_v13 = vld [vmem:[%s4710_s24 + $0x38] sm:$0xff]  }
 0x281   : > { %4414 = vpow2.f32 %v3682_v14  ;;  %v3684_v17 = vmul.f32 -1.442695, %v1248_v15 }
 0x282   : > { %4416 = vpow2.f32 %v3683_v16 }
 0x283   : > { %4418 = vpow2.f32 %v3684_v17  ;;  %3993 = vmatpush3.bf16.msra.mxu0 %v4320_v6 }
 0x284   : > { %3994 = vmatprep.subr.bf16.mxu0 %v4639_v52 }
 0x287   : > { %3995 = vmatpush3.bf16.msra.mxu0 %v4322_v8 }
 0x288   : > { %3996 = vmatprep.subr.bf16.mxu0 %v4639_v52 }
 0x28a   : > { %v4413_v18 = vpop.eup %4412 }
 0x28b   : > { %v4415_v19 = vpop.eup %4414  ;;  %v1262_v20 = vadd.f32 1.0, %v4413_v18  ;;  %3997 = vmatpush3.bf16.msra.mxu0 %v4324_v10 }
 0x28c   : > { %v4417_v21 = vpop.eup %4416  ;;  %v1263_v23 = vadd.f32 1.0, %v4415_v19  ;;  %3998 = vmatprep.subr.bf16.mxu0 %v4639_v52 }
 0x28d   : > { %v4419_v24 = vpop.eup %4418  ;;  %4420 = vrcp.f32 %v1262_v20  ;;  %v1264_v25 = vadd.f32 1.0, %v4417_v21  ;;  %v3702_v21 = vld [vmem:[%s5425_s3] ss:$0 sm:$0xff]  ;;  %s5434_s3 = sld [smem:[#allocation25_spill]] }
 0x28e   : > { %4422 = vrcp.f32 %v1263_v23  ;;  %v1265_v26 = vadd.f32 1.0, %v4419_v24 }
 0x28f   : > { %4424 = vrcp.f32 %v1264_v25 }
 0x290   : > { %4426 = vrcp.f32 %v1265_v26 }
 0x297   : > { %v4421_v27 = vpop.eup %4420 }
 0x298   : > { %v4423_v28 = vpop.eup %4422  ;;  %v1274_v31 = vmul.f32 %v4421_v27, %v1242_v7  ;;  %v4321_v7 = vld [vmem:[%s4710_s24 + $0x20] sm:$0xff]  }
 0x299   : > { %v4425_v29 = vpop.eup %4424  ;;  %v1275_v33 = vmul.f32 %v4423_v28, %v1244_v9  ;;  %v4323_v9 = vld [vmem:[%s4710_s24 + $0x28] sm:$0xff]   ;;  %v3703_v27 = vld [vmem:[%s5426_s8] ss:$0 sm:$0xff] }
 0x29a   : > { %v4427_v30 = vpop.eup %4426  ;;  %v1276_v32 = vmul.f32 %v4425_v29, %v1246_v12  ;;  %v4326_v12 = vld [vmem:[%s5418_s14 + $0x38] sm:$0xff]  }
 0x29b   : > { %v1277_v34 = vmul.f32 %v4427_v30, %v1248_v15  ;;  %3999 = vmatpush3.bf16.msra.mxu0 %v4326_v12 }
 0x29c   : > { %v1311_v35 = vpack.c.bf16 %v1276_v32, %v1274_v31  ;;  %4024 = vmatprep.subr.bf16.mxu0 %v4639_v52  ;;  %v4328_v31 = vld [vmem:[%s5419_s6] sm:$0xff]  }
 0x29d   : > { %v1312_v36 = vpack.c.bf16 %v1277_v34, %v1275_v33  ;;  %v4329_v33 = vld [vmem:[%s5419_s6 + $0x8] sm:$0xff]   ;;  %v4330_v34 = vld [vmem:[%s5419_s6 + $0x10] sm:$0xff]  }
 0x29f   : > { %1447 = vmatprep.mubr.bf16.mxu1 %v1312_v36  ;;  %v4332_v36 = vld [vmem:[%s5419_s6 + $0x20] sm:$0xff]  }
 0x2a0   : > { %1448 = vmatmul.mubr.bf16.vlgmr.msra.gmra.mrb[0].mxu1 %v1311_v35  ;;  %v4331_v35 = vld [vmem:[%s5419_s6 + $0x18] sm:$0xff]  }
 0x2a1   : > { %4005 = vmatpush3.bf16.msra.mxu1 %v4313_v51  ;;  %4020 = vmatprep.mubr.msk.bf16.mxu1 %vm4640_vm0, %v4639_v52 }
 0x2a2   : > { %4006 = vmatprep.subr.bf16.mxu1 %v4639_v52 }
 0x2a5   : > { %4007 = vmatpush3.bf16.msra.mxu1 %v4315_v54 }
 0x2a6   : > { %4008 = vmatprep.subr.bf16.mxu1 %v4639_v52 }
 0x2a9   : > { %4009 = vmatpush3.bf16.msra.mxu1 %v4317_v0 }
 0x2aa   : > { %4010 = vmatprep.subr.bf16.mxu1 %v4639_v52 }
 0x2ad   : > { %4011 = vmatpush3.bf16.msra.mxu1 %v4319_v5 }
 0x2ae   : > { %4012 = vmatprep.subr.bf16.mxu1 %v4639_v52 }
 0x2b1   : > { %4013 = vmatpush3.bf16.msra.mxu1 %v4321_v7 }
 0x2b2   : > { %4014 = vmatprep.subr.bf16.mxu1 %v4639_v52 }
 0x2b5   : > { %4015 = vmatpush3.bf16.msra.mxu1 %v4323_v9 }
 0x2b6   : > { %4016 = vmatprep.subr.bf16.mxu1 %v4639_v52 }
 0x2b9   : > { %4017 = vmatpush3.bf16.msra.mxu1 %v4325_v11 }
 0x2ba   : > { %4018 = vmatprep.subr.bf16.mxu1 %v4639_v52 }
 0x2bd   : > { %4019 = vmatpush3.bf16.msra.mxu1 %v4327_v13 }
 0x2be   : > { %4044 = vmatprep.subr.bf16.mxu1 %v4639_v52 }
 0x373   : > { %v3877_v37 = vpop.f32.mrb[0].mxu1 }
 0x374   : > { %v3878_v39 = vpop.f32.mrb[1].mxu1 }
 0x375   : > { %v3879_v40 = vadd.f32 %v3878_v39, %v3877_v37  ;;  %v3880_v41 = vpop.f32.mrb[2].mxu1  ;;  %v4333_v37 = vld [vmem:[%s5419_s6 + $0x28] sm:$0xff]   ;;  %v4335_v39 = vld [vmem:[%s5419_s6 + $0x38] sm:$0xff]  }
 0x376   : > { %v3881_v42 = vpop.f32.mrb[3].mxu1 }
 0x377   : > { %v1450_v43 = vadd.f32 %v3879_v40, %v3685_v38  ;;  %v3882_v44 = vadd.f32 %v3881_v42, %v3880_v41  ;;  %v3704_v40 = vld [vmem:[%s4705_s19] ss:$0 sm:$0xff] }
 0x378   : > { %v3713_v42 = vld [vmem:[%s4715_s30] ss:$0 sm:$0xff] }
 0x379   : > { %v1456_v45 = vmul.f32 0.5, %v1450_v43  ;;  %v1453_v46 = vadd.f32 %v3882_v44, %v3685_v38  ;;  %v4334_v38 = vld [vmem:[%s5419_s6 + $0x30] sm:$0xff]  }
 0x37b   : > { %v1457_v47 = vmul.f32 0.5, %v1453_v46  ;;  %v4932_v48 = vadd.f32 %v4878_v1, %v1456_v45 }
 0x37d   : > { %1462 = vadd.xlane.f32.xlu0 %v4932_v48  ;;  %v4936_v49 = vadd.f32 %v4881_v2, %v1457_v47 }
 0x37f   : > { %1464 = vadd.xlane.f32.xlu1 %v4936_v49 }
 0x40a   : > { %v1463_v1 = vpop.xlane.xlu0 %1462 }
 0x40b   : > { %v1466_v2 = vmul.f32 0.0078125, %v1463_v1 }
 0x40c   : > { %v1465_v55 = vpop.xlane.xlu1 %1464 }
 0x40d   : > { %v1468_v56 = vsub.f32 %v4932_v48, %v1466_v2  ;;  %v1467_v57 = vmul.f32 0.0078125, %v1465_v55 }
 0x40f   : > { %v1469_v58 = vsub.f32 %v4936_v49, %v1467_v57  ;;  %v1470_v59 = vmul.f32 %v1468_v56, %v1468_v56 }
 0x411   : > { %1472 = vadd.xlane.f32.xlu0 %v1470_v59  ;;  %v1471_v60 = vmul.f32 %v1469_v58, %v1469_v58 }
 0x413   : > { %1474 = vadd.xlane.f32.xlu1 %v1471_v60 }
 0x49e   : > { %v1473_v14 = vpop.xlane.xlu0 %1472 }
 0x49f   : > { %v1476_v15 = vmul.f32 0.0078125, %v1473_v14 }
 0x4a0   : > { %v1475_v16 = vpop.xlane.xlu1 %1474 }
 0x4a1   : > { %v1478_v17 = vadd.f32 1e-05, %v1476_v15  ;;  %v1477_v18 = vmul.f32 0.0078125, %v1475_v16 }
 0x4a3   : > { %4428 = vrsqrt.f32 %v1478_v17  ;;  %v1479_v19 = vadd.f32 1e-05, %v1477_v18 }
 0x4a5   : > { %4430 = vrsqrt.f32 %v1479_v19 }
 0x4ad   : > { %v4429_v20 = vpop.eup %4428 }
 0x4ae   : > { %v1482_v23 = vmul.f32 %v4429_v20, %v1468_v56 }
 0x4af   : > { %v4431_v24 = vpop.eup %4430 }
 0x4b0   : > { %v1483_v25 = vmul.f32 %v4431_v24, %v1469_v58  ;;  %v1490_v26 = vmul.f32 %v3702_v21, %v1482_v23  ;;  %v3722_v58 = vld [vmem:[%s5427_s1] ss:$0 sm:$0xff]  ;;  %s5428_s1 = sld [smem:[#allocation16_spill]] }
 0x4b2   : > { %v1491_v28 = vmul.f32 %v3702_v21, %v1483_v25  ;;  %v1498_v29 = vadd.f32 %v3703_v27, %v1490_v26 }
 0x4b4   : > { %v1499_v30 = vadd.f32 %v3703_v27, %v1491_v28 }
 0x4b6   : > { %v1500_v32 = vpack.c.bf16 %v1499_v30, %v1498_v29 }
 0x4b8   : > { %4001 = vmatmul.mubr.bf16.vlgmr.msra.gmra.mrb[4].mxu0 %v1500_v32  ;;  %4021 = vmatmul.mubr.bf16.vlgmr.msra.gmra.mrb[4].mxu1 %v1500_v32 }
 0x4b9   : > { %4025 = vmatpush3.bf16.msra.mxu0 %v4328_v31  ;;  %4040 = vmatprep.mubr.msk.bf16.mxu0 %vm4640_vm0, %v4639_v52 }
 0x4ba   : > { %4026 = vmatprep.subr.bf16.mxu0 %v4639_v52  ;;  %4046 = vmatprep.mubr.msk.bf16.mxu1 %vm4640_vm0, %v4639_v52 }
 0x4bd   : > { %4027 = vmatpush3.bf16.msra.mxu0 %v4329_v33 }
 0x4be   : > { %4028 = vmatprep.subr.bf16.mxu0 %v4639_v52 }
 0x4c1   : > { %4029 = vmatpush3.bf16.msra.mxu0 %v4330_v34 }
 0x4c2   : > { %4030 = vmatprep.subr.bf16.mxu0 %v4639_v52 }
 0x4c5   : > { %4031 = vmatpush3.bf16.msra.mxu0 %v4331_v35 }
 0x4c6   : > { %4032 = vmatprep.subr.bf16.mxu0 %v4639_v52 }
 0x4c9   : > { %4033 = vmatpush3.bf16.msra.mxu0 %v4332_v36 }
 0x4ca   : > { %4034 = vmatprep.subr.bf16.mxu0 %v4639_v52 }
 0x4cd   : > { %4035 = vmatpush3.bf16.msra.mxu0 %v4333_v37 }
 0x4ce   : > { %4036 = vmatprep.subr.bf16.mxu0 %v4639_v52 }
 0x4d1   : > { %4037 = vmatpush3.bf16.msra.mxu0 %v4334_v38 }
 0x4d2   : > { %4038 = vmatprep.subr.bf16.mxu0 %v4639_v52 }
 0x4d5   : > { %4039 = vmatpush3.bf16.msra.mxu0 %v4335_v39 }
 0x4d6   : > { %4068 = vmatprep.subr.bf16.mxu0 %v4639_v52 }
 0x4d8   : > { %4041 = vmatmul.mubr.bf16.vlgmr.msra.gmra.mrb[8].mxu0 %v1500_v32 }
 0x4d9   : > { %4070 = vmatprep.mubr.msk.bf16.mxu0 %vm4640_vm0, %v4639_v52 }
 0x58b   : > { %v1606_v41 = vpop.f32.mrb[4].mxu0  ;;  %v1719_v43 = vpop.f32.mrb[4].mxu1 }
 0x58c   : > { %v4002_v44 = vpop.f32.mrb[5].mxu0  ;;  %v4022_v45 = vpop.f32.mrb[5].mxu1  ;;  %v1607_v50 = vadd.f32 %v3704_v40, %v1606_v41  ;;  %v1720_v51 = vadd.f32 %v3713_v42, %v1719_v43 }
 0x58d   : > { %v1609_v46 = vpop.f32.mrb[6].mxu0  ;;  %v1722_v47 = vpop.f32.mrb[6].mxu1 }
 0x58e   : > { %v1610_v53 = vadd.f32 %v3704_v40, %v1609_v46  ;;  %v1723_v54 = vadd.f32 %v3713_v42, %v1722_v47  ;;  %v4003_v1 = vpop.f32.mrb[7].mxu0  ;;  %v4023_v2 = vpop.f32.mrb[7].mxu1 }
 0x590   : > { %v1613_v55 = vpack.c.bf16 %v1610_v53, %v1607_v50  ;;  %v1726_v56 = vpack.c.bf16 %v1723_v54, %v1720_v51 }
 0x592   : > { %1848 = vrot.lane.b32.xlu0 %v1726_v56, %s4641_s11  ;;  %1841 = vrot.lane.b32.xlu1 %v1613_v55, %s4641_s11  ;;  %v1869_v57 = vsel %vm1864_vm1, %v1726_v56, 0 }
 0x593   : > { %4045 = vmatpush3.bf16.xpose.msra.mxu1 %v1869_v57 }
 0x594   : > { %4050 = vmatprep.subr.bf16.mxu1 %v4639_v52 }
 0x596   : > { %1852 = vrot.lane.b32.xlu0 %v1726_v56, %s4642_s23  ;;  %1850 = vrot.lane.b32.xlu1 %v1726_v56, %s5379_s28 }
 0x59a   : > { %1843 = vrot.lane.b32.xlu1 %v1613_v55, %s5379_s28  ;;  %4047 = vmatmul.mubr.msk.bf16.vlgmr.msra.gmra.mrb[8].mxu1 %vm1864_vm1, %v1613_v55 }
 0x59b   : > { %4052 = vmatprep.mubr.msk.bf16.mxu1 %vm4640_vm0, %v4639_v52 }
 0x59e   : > { %1845 = vrot.lane.b32.xlu1 %v1613_v55, %s4642_s23 }
 0x5ab   : > { %v1832_v59 = vpop.f32.mrb[8].mxu0 }
 0x5ac   : > { %v4042_v60 = vpop.f32.mrb[9].mxu0  ;;  %v1833_v0 = vadd.f32 %v3722_v58, %v1832_v59 }
 0x5ad   : > { %v1835_v61 = vpop.f32.mrb[10].mxu0 }
 0x5ae   : > { %v1836_v4 = vadd.f32 %v3722_v58, %v1835_v61  ;;  %v4043_v5 = vpop.f32.mrb[11].mxu0 }
 0x5b0   : > { %v5017_v6 = vpack.c.bf16 %v1836_v4, %v1833_v0 }
 0x5b2   : > { %4069 = vmatpush3.bf16.msra.mxu0 %v5017_v6 }
 0x5b3   : > { %4080 = vmatprep.subr.bf16.mxu0 %v4639_v52 }
 0x604   : > { %v1849_v7 = vpop.permute.xlu0 %1848  ;;  %v1842_v8 = vpop.permute.xlu1 %1841 }
 0x605   : > { %v1916_v9 = vsel %vm1864_vm1, %v1849_v7, 0 }
 0x606   : > { %4051 = vmatpush3.bf16.xpose.msra.mxu1 %v1916_v9 }
 0x607   : > { %4056 = vmatprep.subr.bf16.mxu1 %v4639_v52 }
 0x608   : > { %v1851_v10 = vpop.permute.xlu1 %1850  ;;  %v1853_v12 = vpop.permute.xlu0 %1852 }
 0x609   : > { %v1963_v11 = vsel %vm1864_vm1, %v1851_v10, 0  ;;  %v2010_v14 = vsel %vm1864_vm1, %v1853_v12, 0 }
 0x60c   : > { %v1844_v13 = vpop.permute.xlu1 %1843 }
 0x60d   : > { %4053 = vmatmul.mubr.msk.bf16.vlgmr.msra.gmra.mrb[12].mxu1 %vm1864_vm1, %v1842_v8 }
 0x60e   : > { %4057 = vmatpush3.bf16.xpose.msra.mxu1 %v1963_v11  ;;  %4058 = vmatprep.mubr.msk.bf16.mxu1 %vm4640_vm0, %v4639_v52 }
 0x60f   : > { %4062 = vmatprep.subr.bf16.mxu1 %v4639_v52 }
 0x610   : > { %v1846_v15 = vpop.permute.xlu1 %1845 }
 0x615   : > { %4059 = vmatmul.mubr.msk.bf16.vlgmr.msra.gmra.mrb[16].mxu1 %vm1864_vm1, %v1844_v13 }
 0x616   : > { %4063 = vmatpush3.bf16.xpose.msra.mxu1 %v2010_v14  ;;  %4064 = vmatprep.mubr.msk.bf16.mxu1 %vm4640_vm0, %v4639_v52 }
 0x617   : > { %4074 = vmatprep.subr.bf16.mxu1 %v4639_v52 }
 0x61d   : > { %4065 = vmatmul.mubr.msk.bf16.vlgmr.msra.gmra.mrb[20].mxu1 %vm1864_vm1, %v1846_v15 }
 0x61e   : > { %4076 = vmatprep.mubr.msk.bf16.mxu1 %vm4640_vm0, %v4639_v52 }
 0x66d   : > { %v1905_v16 = vpop.f32.mrb[8].mxu1 }
 0x66e   : > { %v4048_v17 = vpop.f32.mrb[9].mxu1  ;;  %v2054_v18 = vsel %vm2053_vm2, %v1905_v16, -inf }
 0x66f   : > { %2055 = vmax.xlane.f32.xlu0 %v2054_v18  ;;  %v1908_v19 = vpop.f32.mrb[10].mxu1 }
 0x670   : > { %v4049_v20 = vpop.f32.mrb[11].mxu1  ;;  %v2057_v21 = vsel %vm2053_vm2, %v1908_v19, -inf }
 0x671   : > { %2058 = vmax.xlane.f32.xlu1 %v2057_v21 }
 0x6e0   : > { %v1952_v23 = vpop.f32.mrb[12].mxu1 }
 0x6e1   : > { %v4054_v24 = vpop.f32.mrb[13].mxu1  ;;  %v2060_v25 = vsel %vm2053_vm2, %v1952_v23, -inf }
 0x6e2   : > { %2061 = vmax.xlane.f32.xlu0 %v2060_v25  ;;  %v1955_v26 = vpop.f32.mrb[14].mxu1 }
 0x6e3   : > { %v4055_v27 = vpop.f32.mrb[15].mxu1  ;;  %v2063_v28 = vsel %vm2053_vm2, %v1955_v26, -inf }
 0x6e6   : > { %2064 = vmax.xlane.f32.xlu0 %v2063_v28 }
 0x6e8   : > { %v1999_v29 = vpop.f32.mrb[16].mxu1 }
 0x6e9   : > { %v4060_v30 = vpop.f32.mrb[17].mxu1  ;;  %v2066_v31 = vsel %vm2053_vm2, %v1999_v29, -inf }
 0x6ea   : > { %2067 = vmax.xlane.f32.xlu0 %v2066_v31  ;;  %v2002_v32 = vpop.f32.mrb[18].mxu1 }
 0x6eb   : > { %v4061_v33 = vpop.f32.mrb[19].mxu1  ;;  %v2069_v34 = vsel %vm2053_vm2, %v2002_v32, -inf }
 0x6ec   : > { %2070 = vmax.xlane.f32.xlu1 %v2069_v34 }
 0x6f0   : > { %v2046_v35 = vpop.f32.mrb[20].mxu1 }
 0x6f1   : > { %v4066_v36 = vpop.f32.mrb[21].mxu1  ;;  %v2072_v37 = vsel %vm2053_vm2, %v2046_v35, -inf }
 0x6f2   : > { %2073 = vmax.xlane.f32.xlu0 %v2072_v37  ;;  %v5043_v38 = vpop.f32.mrb[22].mxu1 }
 0x6f3   : > { %v4067_v39 = vpop.f32.mrb[23].mxu1  ;;  %v2075_v40 = vsel %vm2053_vm2, %v5043_v38, -inf }
 0x6f4   : > { %2076 = vmax.xlane.f32.xlu1 %v2075_v40 }
 0x6fc   : > { %v2056_v41 = vpop.xlane.xlu0 %2055 }
 0x6fd   : > { %v2078_v42 = vsub.f32 %v1905_v16, %v2056_v41 }
 0x6fe   : > { %v2059_v43 = vpop.xlane.xlu1 %2058 }
 0x6ff   : > { %v2086_v44 = vmul.f32 1.442695, %v2078_v42  ;;  %v2079_v45 = vsub.f32 %v1908_v19, %v2059_v43 }
 0x701   : > { %4432 = vpow2.f32 %v2086_v44  ;;  %v2088_v46 = vmul.f32 1.442695, %v2079_v45 }
 0x703   : > { %4434 = vpow2.f32 %v2088_v46 }
 0x70b   : > { %v4433_v47 = vpop.eup %4432 }
 0x70c   : > { %v2102_v50 = vsel %vm2053_vm2, %v4433_v47, 0.0 }
 0x70d   : > { %v4435_v51 = vpop.eup %4434  ;;  %2103 = vadd.xlane.f32.xlu0 %v2102_v50 }
 0x70e   : > { %v2105_v53 = vsel %vm2053_vm2, %v4435_v51, 0.0 }
 0x70f   : > { %2106 = vadd.xlane.f32.xlu1 %v2105_v53 }
 0x76f   : > { %v2062_v54 = vpop.xlane.xlu0 %2061 }
 0x770   : > { %v2080_v1 = vsub.f32 %v1952_v23, %v2062_v54 }
 0x772   : > { %v2090_v2 = vmul.f32 1.442695, %v2080_v1 }
 0x773   : > { %v2065_v55 = vpop.xlane.xlu0 %2064 }
 0x774   : > { %4436 = vpow2.f32 %v2090_v2  ;;  %v2081_v56 = vsub.f32 %v1955_v26, %v2065_v55 }
 0x776   : > { %v2092_v57 = vmul.f32 1.442695, %v2081_v56 }
 0x777   : > { %v2068_v58 = vpop.xlane.xlu0 %2067 }
 0x778   : > { %4438 = vpow2.f32 %v2092_v57  ;;  %v2082_v59 = vsub.f32 %v1999_v29, %v2068_v58 }
 0x779   : > { %v2071_v60 = vpop.xlane.xlu1 %2070 }
 0x77a   : > { %v2094_v61 = vmul.f32 1.442695, %v2082_v59  ;;  %v2083_v0 = vsub.f32 %v2002_v32, %v2071_v60  ;;  %v4336_v60 = vld [vmem:[%s5428_s1] sm:$0xff]  }
 0x77c   : > { %4440 = vpow2.f32 %v2094_v61  ;;  %v2096_v4 = vmul.f32 1.442695, %v2083_v0  ;;  %v4337_v61 = vld [vmem:[%s5428_s1 + $0x8] sm:$0xff]  }
 0x77e   : > { %v4437_v5 = vpop.eup %4436  ;;  %4442 = vpow2.f32 %v2096_v4 }
 0x77f   : > { %v2074_v7 = vpop.xlane.xlu0 %2073  ;;  %v2108_v8 = vsel %vm2053_vm2, %v4437_v5, 0.0 }
 0x780   : > { %v2084_v9 = vsub.f32 %v2046_v35, %v2074_v7  ;;  %2109 = vadd.xlane.f32.xlu0 %v2108_v8  ;;  %v4338_v8 = vld [vmem:[%s5428_s1 + $0x10] sm:$0xff]  }
 0x781   : > { %v2077_v19 = vpop.xlane.xlu1 %2076 }
 0x782   : > { %v4439_v10 = vpop.eup %4438  ;;  %v2098_v11 = vmul.f32 1.442695, %v2084_v9  ;;  %v2085_v27 = vsub.f32 %v5043_v38, %v2077_v19  ;;  %v4343_v19 = vld [vmem:[%s5428_s1 + $0x38] sm:$0xff]  }
 0x783   : > { %v2111_v12 = vsel %vm2053_vm2, %v4439_v10, 0.0 }
 0x784   : > { %4444 = vpow2.f32 %v2098_v11  ;;  %2112 = vadd.xlane.f32.xlu1 %v2111_v12  ;;  %v2100_v29 = vmul.f32 1.442695, %v2085_v27 }
 0x786   : > { %v4441_v13 = vpop.eup %4440 }
 0x787   : > { %v2114_v14 = vsel %vm2053_vm2, %v4441_v13, 0.0 }
 0x788   : > { %v4443_v15 = vpop.eup %4442  ;;  %2115 = vadd.xlane.f32.xlu0 %v2114_v14 }
 0x789   : > { %v2117_v16 = vsel %vm2053_vm2, %v4443_v15, 0.0 }
 0x78a   : > { %2118 = vadd.xlane.f32.xlu1 %v2117_v16  ;;  %v4340_v16 = vld [vmem:[%s5428_s1 + $0x20] sm:$0xff]  }
 0x78e   : > { %v4445_v17 = vpop.eup %4444 }
 0x78f   : > { %v2120_v18 = vsel %vm2053_vm2, %v4445_v17, 0.0 }
 0x790   : > { %2121 = vadd.xlane.f32.xlu0 %v2120_v18  ;;  %v4342_v18 = vld [vmem:[%s5428_s1 + $0x30] sm:$0xff]  }
 0x79a   : > { %v2104_v20 = vpop.xlane.xlu0 %2103 }
 0x79b   : > { %4446 = vrcp.f32 %v2104_v20  ;;  %1858 = vrot.lane.b32.xlu1 %v5017_v6, %s5379_s28 }
 0x79c   : > { %v2107_v21 = vpop.xlane.xlu1 %2106 }
 0x79d   : > { %4448 = vrcp.f32 %v2107_v21 }
 0x79e   : > { %4450 = vpow2.f32 %v2100_v29 }
 0x7a5   : > { %v4447_v23 = vpop.eup %4446 }
 0x7a6   : > { %1855 = vrot.lane.b32.xlu0 %v5017_v6, %s4641_s11  ;;  %v2134_v25 = vmul.f32 %v4447_v23, %v4433_v47 }
 0x7a7   : > { %v4449_v24 = vpop.eup %4448 }
 0x7a8   : > { %v2135_v26 = vmul.f32 %v4449_v24, %v4435_v51  ;;  %v4451_v30 = vpop.eup %4450 }
 0x7a9   : > { %v2123_v31 = vsel %vm2053_vm2, %v4451_v30, 0.0 }
 0x7aa   : > { %v2142_v28 = vpack.c.bf16 %v2135_v26, %v2134_v25 }
 0x7ac   : > { %4071 = vmatmul.mubr.msk.bf16.vlgmr.msra.gmra.mrb[12].mxu0 %vm2053_vm2, %v2142_v28 }
 0x7ad   : > { %4082 = vmatprep.mubr.msk.bf16.mxu0 %vm4640_vm0, %v4639_v52 }
 0x7bf   : > { %2124 = vadd.xlane.f32.xlu1 %v2123_v31 }
 0x7d0   : > { %1861 = vrot.lane.b32.xlu1 %v5017_v6, %s4642_s23 }
 0x80d   : > { %v2110_v32 = vpop.xlane.xlu0 %2109 }
 0x811   : > { %v2113_v33 = vpop.xlane.xlu1 %2112 }
 0x812   : > { %4452 = vrcp.f32 %v2113_v33 }
 0x813   : > { %4454 = vrcp.f32 %v2110_v32 }
 0x815   : > { %v2116_v34 = vpop.xlane.xlu0 %2115 }
 0x816   : > { %4456 = vrcp.f32 %v2116_v34 }
 0x817   : > { %v2119_v35 = vpop.xlane.xlu1 %2118 }
 0x818   : > { %4458 = vrcp.f32 %v2119_v35 }
 0x81b   : > { %v1859_v36 = vpop.permute.xlu1 %1858 }
 0x81c   : > { %v4453_v37 = vpop.eup %4452  ;;  %4081 = vmatpush3.bf16.msra.mxu0 %v1859_v36 }
 0x81d   : > { %v2122_v38 = vpop.xlane.xlu0 %2121  ;;  %4092 = vmatprep.subr.bf16.mxu0 %v4639_v52  ;;  %v4455_v39 = vpop.eup %4454  ;;  %v2137_v40 = vmul.f32 %v4453_v37, %v4439_v10 }
 0x81e   : > { %v2136_v42 = vmul.f32 %v4455_v39, %v4437_v5  ;;  %4460 = vrcp.f32 %v2122_v38 }
 0x820   : > { %v4457_v41 = vpop.eup %4456  ;;  %v2143_v46 = vpack.c.bf16 %v2137_v40, %v2136_v42 }
 0x821   : > { %v1856_v43 = vpop.permute.xlu0 %1855  ;;  %v2138_v44 = vmul.f32 %v4457_v41, %v4441_v13 }
 0x822   : > { %v4459_v6 = vpop.eup %4458  ;;  %4075 = vmatpush3.bf16.msra.mxu1 %v1856_v43 }
 0x823   : > { %v2139_v45 = vmul.f32 %v4459_v6, %v4443_v15  ;;  %4086 = vmatprep.subr.bf16.mxu1 %v4639_v52  ;;  %v4339_v15 = vld [vmem:[%s5428_s1 + $0x18] sm:$0xff]  }
 0x825   : > { %4077 = vmatmul.mubr.msk.bf16.vlgmr.msra.gmra.mrb[24].mxu1 %vm2053_vm2, %v2143_v46  ;;  %v2144_v47 = vpack.c.bf16 %v2139_v45, %v2138_v44 }
 0x826   : > { %4088 = vmatprep.mubr.msk.bf16.mxu1 %vm4640_vm0, %v4639_v52 }
 0x827   : > { %4083 = vmatmul.mubr.msk.bf16.vlgmr.msra.gmra.mrb[16].mxu0 %vm2053_vm2, %v2144_v47 }
 0x828   : > { %4108 = vmatprep.mubr.msk.bf16.mxu0 %vm4640_vm0, %v4639_v52  ;;  %v4461_v53 = vpop.eup %4460  ;;  %4093 = vmatpush3.bf16.msra.mxu0 %v4336_v60 }
 0x829   : > { %v2140_v1 = vmul.f32 %v4461_v53, %v4445_v17  ;;  %4094 = vmatprep.subr.bf16.mxu0 %v4639_v52  ;;  %v4341_v17 = vld [vmem:[%s5428_s1 + $0x28] sm:$0xff]   ;;  %s5433_s1 = sld [smem:[#allocation19_spill]] }
 0x82c   : > { %4095 = vmatpush3.bf16.msra.mxu0 %v4337_v61 }
 0x82d   : > { %4096 = vmatprep.subr.bf16.mxu0 %v4639_v52 }
 0x830   : > { %4097 = vmatpush3.bf16.msra.mxu0 %v4338_v8 }
 0x831   : > { %4098 = vmatprep.subr.bf16.mxu0 %v4639_v52 }
 0x834   : > { %4099 = vmatpush3.bf16.msra.mxu0 %v4339_v15 }
 0x835   : > { %4100 = vmatprep.subr.bf16.mxu0 %v4639_v52 }
 0x838   : > { %4101 = vmatpush3.bf16.msra.mxu0 %v4340_v16 }
 0x839   : > { %4102 = vmatprep.subr.bf16.mxu0 %v4639_v52 }
 0x83c   : > { %4103 = vmatpush3.bf16.msra.mxu0 %v4341_v17 }
 0x83d   : > { %4104 = vmatprep.subr.bf16.mxu0 %v4639_v52 }
 0x840   : > { %4105 = vmatpush3.bf16.msra.mxu0 %v4342_v18 }
 0x841   : > { %4106 = vmatprep.subr.bf16.mxu0 %v4639_v52 }
 0x844   : > { %4107 = vmatpush3.bf16.msra.mxu0 %v4343_v19 }
 0x845   : > { %4132 = vmatprep.subr.bf16.mxu0 %v4639_v52 }
 0x84c   : > { %v2125_v50 = vpop.xlane.xlu1 %2124 }
 0x84d   : > { %4462 = vrcp.f32 %v2125_v50 }
 0x850   : > { %v1862_v51 = vpop.permute.xlu1 %1861 }
 0x851   : > { %4087 = vmatpush3.bf16.msra.mxu1 %v1862_v51 }
 0x852   : > { %4112 = vmatprep.subr.bf16.mxu1 %v4639_v52 }
 0x857   : > { %v4463_v54 = vpop.eup %4462 }
 0x858   : > { %v2141_v2 = vmul.f32 %v4463_v54, %v4451_v30 }
 0x85a   : > { %v2145_v55 = vpack.c.bf16 %v2141_v2, %v2140_v1 }
 0x85c   : > { %4089 = vmatmul.mubr.msk.bf16.vlgmr.msra.gmra.mrb[28].mxu1 %vm2053_vm2, %v2145_v55 }
 0x85d   : > { %4128 = vmatprep.mubr.msk.bf16.mxu1 %vm4640_vm0, %v4639_v52 }
 0x87f   : > { %v2183_v56 = vpop.f32.mrb[12].mxu0 }
 0x880   : > { %v4072_v57 = vpop.f32.mrb[13].mxu0 }
 0x881   : > { %v2186_v58 = vpop.f32.mrb[14].mxu0 }
 0x882   : > { %v4073_v59 = vpop.f32.mrb[15].mxu0 }
 0x8f8   : > { %v2227_v0 = vpop.f32.mrb[24].mxu1 }
 0x8f9   : > { %v4078_v4 = vpop.f32.mrb[25].mxu1 }
 0x8fa   : > { %v2230_v5 = vpop.f32.mrb[26].mxu1  ;;  %v2271_v7 = vpop.f32.mrb[16].mxu0 }
 0x8fb   : > { %v4257_v9 = vpack.i.bf16 %v2230_v5, %v2227_v0  ;;  %v4079_v10 = vpop.f32.mrb[27].mxu1  ;;  %v4084_v11 = vpop.f32.mrb[17].mxu0 }
 0x8fc   : > { %v2274_v12 = vpop.f32.mrb[18].mxu0 }
 0x8fd   : > { %v4262_v13 = vpack.i.bf16 %v2274_v12, %v2271_v7  ;;  %4258 = vrot.lane.b32.xlu1 %v4257_v9, %s4642_s23  ;;  %v4085_v14 = vpop.f32.mrb[19].mxu0  ;;  %s5429_s23 = sld [smem:[#allocation17_spill]] }
 0x8ff   : > { %4263 = vrot.lane.b32.xlu0 %v4262_v13, %s5379_s28  ;;  %s5431_s28 = sld [smem:[#allocation21_spill]] }
 0x903   : > { %v3739_v42 = vld [vmem:[%s5429_s23] ss:$0 sm:$0xff]  ;;  %s5432_s23 = sld [smem:[#allocation18_spill]] }
 0x905   : > { %v4345_v54 = vld [vmem:[%s5431_s28] sm:$0xff]   ;;  %v4347_v60 = vld [vmem:[%s5431_s28 + $0x8] sm:$0xff]   ;;  %v4349_v0 = vld [vmem:[%s5431_s28 + $0x10] sm:$0xff]  }
 0x906   : > { %v4351_v5 = vld [vmem:[%s5431_s28 + $0x18] sm:$0xff]   ;;  %v4353_v8 = vld [vmem:[%s5431_s28 + $0x20] sm:$0xff]   ;;  %v4355_v10 = vld [vmem:[%s5431_s28 + $0x28] sm:$0xff]  }
 0x907   : > { %v4357_v12 = vld [vmem:[%s5431_s28 + $0x30] sm:$0xff]   ;;  %v4359_v14 = vld [vmem:[%s5431_s28 + $0x38] sm:$0xff]  }
 0x92f   : > { %v2315_v20 = vpop.f32.mrb[28].mxu1 }
 0x930   : > { %v4090_v21 = vpop.f32.mrb[29].mxu1 }
 0x931   : > { %v2318_v23 = vpop.f32.mrb[30].mxu1 }
 0x932   : > { %v4267_v24 = vpack.i.bf16 %v2318_v23, %v2315_v20  ;;  %v4091_v25 = vpop.f32.mrb[31].mxu1 }
 0x934   : > { %4268 = vrot.lane.b32.xlu1 %v4267_v24, %s4641_s11  ;;  %s5430_s11 = sld [smem:[#allocation20_spill]]  ;;  %v3748_v24 = vld [vmem:[%s5432_s23] ss:$0 sm:$0xff]  ;;  %s5436_s23 = sld [smem:[#allocation23_spill]] }
 0x93a   : > { %v4344_v53 = vld [vmem:[%s5430_s11] sm:$0xff]   ;;  %v4346_v59 = vld [vmem:[%s5430_s11 + $0x8] sm:$0xff]   ;;  %v4348_v61 = vld [vmem:[%s5430_s11 + $0x10] sm:$0xff]  }
 0x93b   : > { %4113 = vmatpush3.bf16.msra.mxu1 %v4344_v53  ;;  %v4350_v4 = vld [vmem:[%s5430_s11 + $0x18] sm:$0xff]   ;;  %v4352_v7 = vld [vmem:[%s5430_s11 + $0x20] sm:$0xff]   ;;  %v4354_v9 = vld [vmem:[%s5430_s11 + $0x28] sm:$0xff]  }
 0x93c   : > { %4114 = vmatprep.subr.bf16.mxu1 %v4639_v52  ;;  %v4356_v11 = vld [vmem:[%s5430_s11 + $0x30] sm:$0xff]   ;;  %v4358_v13 = vld [vmem:[%s5430_s11 + $0x38] sm:$0xff]   ;;  %s4644_s11 = smov [#allocation4]  }
 0x93d   : > { %s4512_s13 = sshll.u32 %s4644_s11, 4  ;;  %s4513_s13 = int_to_ptr.vmem [resolvable:$false] %s4512_s13 }
 0x93e   : > { %s4514_s14 = scalar_lea.vmem %s4513_s13, 256 }
 0x93f   : > { %4115 = vmatpush3.bf16.msra.mxu1 %v4346_v59 }
 0x940   : > { %4116 = vmatprep.subr.bf16.mxu1 %v4639_v52 }
 0x943   : > { %4117 = vmatpush3.bf16.msra.mxu1 %v4348_v61 }
 0x944   : > { %4118 = vmatprep.subr.bf16.mxu1 %v4639_v52 }
 0x947   : > { %4119 = vmatpush3.bf16.msra.mxu1 %v4350_v4 }
 0x948   : > { %4120 = vmatprep.subr.bf16.mxu1 %v4639_v52 }
 0x94b   : > { %4121 = vmatpush3.bf16.msra.mxu1 %v4352_v7 }
 0x94c   : > { %4122 = vmatprep.subr.bf16.mxu1 %v4639_v52 }
 0x94f   : > { %4123 = vmatpush3.bf16.msra.mxu1 %v4354_v9 }
 0x950   : > { %4124 = vmatprep.subr.bf16.mxu1 %v4639_v52 }
 0x953   : > { %4125 = vmatpush3.bf16.msra.mxu1 %v4356_v11 }
 0x954   : > { %4126 = vmatprep.subr.bf16.mxu1 %v4639_v52 }
 0x957   : > { %4127 = vmatpush3.bf16.msra.mxu1 %v4358_v13 }
 0x958   : > { %4152 = vmatprep.subr.bf16.mxu1 %v4639_v52 }
 0x96f   : > { %v4259_v26 = vpop.permute.xlu1 %4258 }
 0x970   : > { %v4261_v27 = vunpack.i.h.bf16 %v4259_v26  ;;  %v4260_v28 = vunpack.i.l.bf16 %v4259_v26 }
 0x971   : > { %v4264_v29 = vpop.permute.xlu0 %4263 }
 0x972   : > { %v4266_v30 = vunpack.i.h.bf16 %v4264_v29  ;;  %v4265_v31 = vunpack.i.l.bf16 %v4264_v29  ;;  %v2346_v32 = vsel %vm1864_vm1, %v2183_v56, %v4260_v28  ;;  %v2347_v33 = vsel %vm1864_vm1, %v2186_v58, %v4261_v27  ;;  %v3749_v28 = vld [vmem:[%s5433_s1] ss:$0 sm:$0xff]  ;;  %s5435_s1 = sld [smem:[#allocation22_spill]] }
 0x974   : > { %v2350_v37 = vsel %vm2348_vm3, %v2347_v33, %v4266_v30  ;;  %v2349_v38 = vsel %vm2348_vm3, %v2346_v32, %v4265_v31  ;;  %v4360_v33 = vld [vmem:[%s5434_s3] sm:$0xff]  }
 0x978   : > { %v3769_v4 = vld [vmem:[%s5435_s1 + $0x1] ss:$0 sm:$0xff] }
 0x9a6   : > { %v4269_v34 = vpop.permute.xlu1 %4268 }
 0x9a7   : > { %v4271_v35 = vunpack.i.h.bf16 %v4269_v34  ;;  %v4270_v36 = vunpack.i.l.bf16 %v4269_v34  ;;  %v4361_v34 = vld [vmem:[%s5434_s3 + $0x8] sm:$0xff]  }
 0x9a9   : > { %v2352_v39 = vsel %vm2351_vm4, %v2349_v38, %v4270_v36  ;;  %v2353_v40 = vsel %vm2351_vm4, %v2350_v37, %v4271_v35  ;;  %v4362_v35 = vld [vmem:[%s5434_s3 + $0x10] sm:$0xff]   ;;  %v4363_v36 = vld [vmem:[%s5434_s3 + $0x18] sm:$0xff]   ;;  %v4364_v37 = vld [vmem:[%s5434_s3 + $0x20] sm:$0xff]  }
 0x9aa   : > { %v2371_v41 = vpack.c.bf16 %v2353_v40, %v2352_v39  ;;  %v4366_v38 = vld [vmem:[%s5434_s3 + $0x30] sm:$0xff]   ;;  %v4367_v39 = vld [vmem:[%s5434_s3 + $0x38] sm:$0xff]  }
 0x9ac   : > { %4109 = vmatmul.mubr.bf16.vlgmr.msra.gmra.mrb[20].mxu0 %v2371_v41 }
 0x9ad   : > { %4148 = vmatprep.mubr.msk.bf16.mxu0 %vm4640_vm0, %v4639_v52  ;;  %4133 = vmatpush3.bf16.msra.mxu0 %v4345_v54 }
 0x9ae   : > { %4134 = vmatprep.subr.bf16.mxu0 %v4639_v52 }
 0x9b1   : > { %4135 = vmatpush3.bf16.msra.mxu0 %v4347_v60 }
 0x9b2   : > { %4136 = vmatprep.subr.bf16.mxu0 %v4639_v52 }
 0x9b5   : > { %4137 = vmatpush3.bf16.msra.mxu0 %v4349_v0 }
 0x9b6   : > { %4138 = vmatprep.subr.bf16.mxu0 %v4639_v52 }
 0x9b9   : > { %4139 = vmatpush3.bf16.msra.mxu0 %v4351_v5 }
 0x9ba   : > { %4140 = vmatprep.subr.bf16.mxu0 %v4639_v52 }
 0x9bd   : > { %4141 = vmatpush3.bf16.msra.mxu0 %v4353_v8 }
 0x9be   : > { %4142 = vmatprep.subr.bf16.mxu0 %v4639_v52 }
 0x9c1   : > { %4143 = vmatpush3.bf16.msra.mxu0 %v4355_v10 }
 0x9c2   : > { %4144 = vmatprep.subr.bf16.mxu0 %v4639_v52 }
 0x9c5   : > { %4145 = vmatpush3.bf16.msra.mxu0 %v4357_v12 }
 0x9c6   : > { %4146 = vmatprep.subr.bf16.mxu0 %v4639_v52 }
 0x9c9   : > { %4147 = vmatpush3.bf16.msra.mxu0 %v4359_v14  ;;  %v3770_v14 = vld [vmem:[%s5435_s1 + $0x2] ss:$0 sm:$0xff] }
 0xa7f   : > { %v2460_v43 = vpop.f32.mrb[20].mxu0 }
 0xa80   : > { %v2461_v6 = vadd.f32 %v3739_v42, %v2460_v43  ;;  %v4110_v44 = vpop.f32.mrb[21].mxu0 }
 0xa81   : > { %v2463_v45 = vpop.f32.mrb[22].mxu0 }
 0xa82   : > { %v5102_v46 = vadd.f32 %v2461_v6, %v4932_v48  ;;  %v2464_v47 = vadd.f32 %v3739_v42, %v2463_v45  ;;  %v4111_v50 = vpop.f32.mrb[23].mxu0 }
 0xa84   : > { %v5105_v51 = vadd.f32 %v2464_v47, %v4936_v49  ;;  %2471 = vadd.xlane.f32.xlu0 %v5102_v46 }
 0xa86   : > { %2473 = vadd.xlane.f32.xlu1 %v5105_v51 }
 0xb11   : > { %v2472_v48 = vpop.xlane.xlu0 %2471 }
 0xb12   : > { %v2475_v1 = vmul.f32 0.0078125, %v2472_v48 }
 0xb13   : > { %v2474_v49 = vpop.xlane.xlu1 %2473 }
 0xb14   : > { %v2477_v2 = vsub.f32 %v5102_v46, %v2475_v1  ;;  %v2476_v55 = vmul.f32 0.0078125, %v2474_v49 }
 0xb16   : > { %v2478_v56 = vsub.f32 %v5105_v51, %v2476_v55  ;;  %v2479_v57 = vmul.f32 %v2477_v2, %v2477_v2 }
 0xb18   : > { %2481 = vadd.xlane.f32.xlu0 %v2479_v57  ;;  %v2480_v58 = vmul.f32 %v2478_v56, %v2478_v56 }
 0xb1c   : > { %2483 = vadd.xlane.f32.xlu0 %v2480_v58  ;;  %v3768_v58 = vld [vmem:[%s5435_s1] ss:$0 sm:$0xff] }
 0xba5   : > { %v2482_v15 = vpop.xlane.xlu0 %2481 }
 0xba6   : > { %v2485_v16 = vmul.f32 0.0078125, %v2482_v15 }
 0xba8   : > { %v2487_v17 = vadd.f32 1e-05, %v2485_v16 }
 0xba9   : > { %v2484_v18 = vpop.xlane.xlu0 %2483 }
 0xbaa   : > { %4464 = vrsqrt.f32 %v2487_v17  ;;  %v2486_v19 = vmul.f32 0.0078125, %v2484_v18 }
 0xbac   : > { %v2488_v20 = vadd.f32 1e-05, %v2486_v19 }
 0xbae   : > { %4466 = vrsqrt.f32 %v2488_v20 }
 0xbb4   : > { %v4465_v21 = vpop.eup %4464 }
 0xbb5   : > { %v2491_v23 = vmul.f32 %v4465_v21, %v2477_v2 }
 0xbb7   : > { %v2499_v27 = vmul.f32 %v3748_v24, %v2491_v23 }
 0xbb8   : > { %v4467_v25 = vpop.eup %4466 }
 0xbb9   : > { %v2492_v26 = vmul.f32 %v4467_v25, %v2478_v56  ;;  %v2507_v30 = vadd.f32 %v3749_v28, %v2499_v27 }
 0xbbb   : > { %v2500_v29 = vmul.f32 %v3748_v24, %v2492_v26 }
 0xbbd   : > { %v2508_v31 = vadd.f32 %v3749_v28, %v2500_v29  ;;  %v3771_v28 = vld [vmem:[%s5435_s1 + $0x3] ss:$0 sm:$0xff] }
 0xbbf   : > { %v2509_v32 = vpack.c.bf16 %v2508_v31, %v2507_v30 }
 0xbc1   : > { %4129 = vmatmul.mubr.bf16.vlgmr.msra.gmra.mrb[32].mxu1 %v2509_v32  ;;  %4149 = vmatmul.mubr.bf16.vlgmr.msra.gmra.mrb[24].mxu0 %v2509_v32 }
 0xbc2   : > { %4168 = vmatprep.mubr.msk.bf16.mxu1 %vm4640_vm0, %v4639_v52  ;;  %3211 = vmatprep.mubr.bf16.mxu0 %v4638_v22  ;;  %v4365_v22 = vld [vmem:[%s5434_s3 + $0x28] sm:$0xff]   ;;  %s5437_s3 = sld [smem:[#allocation24_spill]] }
 0xbc3   : > { %4153 = vmatpush3.bf16.msra.mxu1 %v4360_v33  ;;  %v3772_v33 = vld [vmem:[%s5435_s1 + $0x4] ss:$0 sm:$0xff] }
 0xbc4   : > { %4154 = vmatprep.subr.bf16.mxu1 %v4639_v52 }
 0xbc7   : > { %4155 = vmatpush3.bf16.msra.mxu1 %v4361_v34 }
 0xbc8   : > { %4156 = vmatprep.subr.bf16.mxu1 %v4639_v52 }
 0xbcb   : > { %4157 = vmatpush3.bf16.msra.mxu1 %v4362_v35 }
 0xbcc   : > { %4158 = vmatprep.subr.bf16.mxu1 %v4639_v52 }
 0xbcf   : > { %4159 = vmatpush3.bf16.msra.mxu1 %v4363_v36 }
 0xbd0   : > { %4160 = vmatprep.subr.bf16.mxu1 %v4639_v52 }
 0xbd3   : > { %4161 = vmatpush3.bf16.msra.mxu1 %v4364_v37 }
 0xbd4   : > { %4162 = vmatprep.subr.bf16.mxu1 %v4639_v52 }
 0xbd7   : > { %4163 = vmatpush3.bf16.msra.mxu1 %v4365_v22 }
 0xbd8   : > { %4164 = vmatprep.subr.bf16.mxu1 %v4639_v52 }
 0xbdb   : > { %4165 = vmatpush3.bf16.msra.mxu1 %v4366_v38 }
 0xbdc   : > { %4166 = vmatprep.subr.bf16.mxu1 %v4639_v52  ;;  %v5163_v52 = vadd.s32 8, %v4921_v62 }
 0xbde   : > { %vm2829_vm13 = vcmp.lt.s32.totalorder %v5163_v52, 15  ;;  %vm2852_vm14 = vcmp.lt.s32.totalorder %v5163_v52, 14  ;;  %vm2875_vm0 = vcmp.lt.s32.totalorder %v5163_v52, 13 }
 0xbdf   : > { %4167 = vmatpush3.bf16.msra.mxu1 %v4367_v39 }
 0xc94   : > { %v2608_v40 = vpop.f32.mrb[32].mxu1  ;;  %v2713_v41 = vpop.f32.mrb[24].mxu0 }
 0xc95   : > { %v3766_v42 = vmul.f32 -1.442695, %v2713_v41  ;;  %v4130_v43 = vpop.f32.mrb[33].mxu1  ;;  %v4150_v6 = vpop.f32.mrb[25].mxu0  ;;  %v3773_v41 = vld [vmem:[%s5435_s1 + $0x5] ss:$0 sm:$0xff] }
 0xc96   : > { %v2611_v44 = vpop.f32.mrb[34].mxu1  ;;  %v2716_v45 = vpop.f32.mrb[26].mxu0 }
 0xc97   : > { %4468 = vpow2.f32 %v3766_v42  ;;  %v3767_v47 = vmul.f32 -1.442695, %v2716_v45  ;;  %v4131_v50 = vpop.f32.mrb[35].mxu1  ;;  %v4151_v53 = vpop.f32.mrb[27].mxu0 }
 0xc98   : > { %v3774_v53 = vld [vmem:[%s5435_s1 + $0x6] ss:$0 sm:$0xff]  ;;  %s5438_s1 = sld [smem:[#allocation28_spill]] }
 0xc99   : > { %4470 = vpow2.f32 %v3767_v47 }
 0xca1   : > { %v4469_v54 = vpop.eup %4468 }
 0xca2   : > { %v2726_v48 = vadd.f32 1.0, %v4469_v54 }
 0xca3   : > { %v4471_v1 = vpop.eup %4470 }
 0xca4   : > { %4472 = vrcp.f32 %v2726_v48  ;;  %v2727_v49 = vadd.f32 1.0, %v4471_v1 }
 0xca6   : > { %4474 = vrcp.f32 %v2727_v49 }
 0xcae   : > { %v4473_v2 = vpop.eup %4472 }
 0xcaf   : > { %v5166_v55 = vmul.f32 %v4473_v2, %v2608_v40 }
 0xcb0   : > { %v4475_v56 = vpop.eup %4474 }
 0xcb1   : > { %v2733_v57 = vmul.f32 %v4475_v56, %v2611_v44  ;;  %v2744_v59 = vrot.slane %v5166_v55, 5  ;;  %v2767_v60 = vrot.slane %v5166_v55, 6  ;;  %v2790_v61 = vrot.slane %v5166_v55, 7 }
 0xcb2   : > { %v2823_v0 = vrot.slane %v5166_v55, 1  ;;  %v2846_v9 = vrot.slane %v5166_v55, 2  ;;  %v2869_v12 = vrot.slane %v5166_v55, 3  ;;  %v2819_v43 = vmul.f32 %v3771_v28, %v5166_v55 }
 0xcb3   : > { %v2745_v5 = vrot.slane %v2733_v57, 5  ;;  %v2768_v7 = vrot.slane %v2733_v57, 6  ;;  %v2791_v8 = vrot.slane %v2733_v57, 7  ;;  %v2824_v10 = vrot.slane %v2733_v57, 1 }
 0xcb4   : > { %v2847_v11 = vrot.slane %v2733_v57, 2  ;;  %v2870_v13 = vrot.slane %v2733_v57, 3  ;;  %v2820_v36 = vmul.f32 %v3771_v28, %v2733_v57  ;;  %v4368_v28 = vld [vmem:[%s5438_s1] ss:$8 sps:$4 sm:$0xff]  }
 0xcb5   : > { %v2747_v15 = vsel %vm2746_vm5, %v2744_v59, %v2745_v5  ;;  %v2748_v16 = vsel %vm2746_vm5, %v2745_v5, %v2744_v59  ;;  %v2770_v17 = vsel %vm2769_vm7, %v2767_v60, %v2768_v7  ;;  %v2771_v18 = vsel %vm2769_vm7, %v2768_v7, %v2767_v60  ;;  %v3776_v5 = vld [vmem:[%s5437_s3] ss:$0 sm:$0xff]  ;;  %s5439_s3 = sld [smem:[#allocation26_spill]] }
 0xcb6   : > { %v2755_v19 = vsel %vm2749_vm6, %v2748_v16, 0.0  ;;  %v2764_v20 = vmul.f32 %v3768_v58, %v2747_v15  ;;  %v2778_v21 = vsel %vm2772_vm8, %v2771_v18, 0.0  ;;  %v2787_v23 = vmul.f32 %v3769_v4, %v2770_v17 }
 0xcb7   : > { %v2763_v24 = vmul.f32 %v3768_v58, %v2755_v19  ;;  %v2786_v25 = vmul.f32 %v3769_v4, %v2778_v21  ;;  %v2793_v26 = vsel %vm2792_vm9, %v2790_v61, %v2791_v8  ;;  %v2794_v27 = vsel %vm2792_vm9, %v2791_v8, %v2790_v61  ;;  %v3775_v61 = vld [vmem:[%s5436_s23] ss:$0 sm:$0xff]  ;;  %s5440_s23 = sld [smem:[#allocation27_spill]] }
 0xcb8   : > { %v2789_v29 = vadd.f32 %v2787_v23, %v2764_v20  ;;  %v2801_v30 = vsel %vm2795_vm10, %v2794_v27, 0.0  ;;  %v2810_v31 = vmul.f32 %v3770_v14, %v2793_v26  ;;  %v2826_v32 = vsel %vm2825_vm11, %v2823_v0, %v2824_v10 }
 0xcb9   : > { %v2788_v34 = vadd.f32 %v2786_v25, %v2763_v24  ;;  %v2809_v35 = vmul.f32 %v3770_v14, %v2801_v30  ;;  %v2827_v37 = vsel %vm2825_vm11, %v2824_v10, %v2823_v0  ;;  %v2849_v39 = vsel %vm2848_vm12, %v2846_v9, %v2847_v11  ;;  %v4373_v30 = vld [vmem:[%s5438_s1 + $0x14] ss:$8 sps:$4 sm:$0xff]  }
 0xcba   : > { %v2812_v22 = vadd.f32 %v2810_v31, %v2789_v29  ;;  %v2835_v38 = vsel %vm2829_vm13, %v2827_v37, 0.0  ;;  %v2850_v40 = vsel %vm2848_vm12, %v2847_v11, %v2846_v9  ;;  %v2872_v47 = vsel %vm2871_vm15, %v2869_v12, %v2870_v13  ;;  %v4370_v29 = vld [vmem:[%s5438_s1 + $0x4] ss:$8 sps:$4 sm:$0xff]   ;;  %v4371_v31 = vld [vmem:[%s5438_s1 + $0x10] ss:$8 sps:$4 sm:$0xff]  }
 0xcbb   : > { %v2811_v42 = vadd.f32 %v2809_v35, %v2788_v34  ;;  %v2858_v6 = vsel %vm2852_vm14, %v2850_v40, 0.0  ;;  %v2843_v45 = vmul.f32 %v3772_v33, %v2835_v38  ;;  %v2873_v50 = vsel %vm2871_vm15, %v2870_v13, %v2869_v12  ;;  %3179 = vmatprep.subr.bf16.mxu0 %v4370_v29  ;;  %v4374_v38 = vld [vmem:[%s5438_s1 + $0x20] ss:$8 sps:$4 sm:$0xff]   ;;  %v4377_v40 = vld [vmem:[%s5438_s1 + $0x30] ss:$8 sps:$4 sm:$0xff]  }
 0xcbc   : > { %v2822_v44 = vadd.f32 %v2820_v36, %v2812_v22  ;;  %v2842_v48 = vmul.f32 %v3772_v33, %v2826_v32  ;;  %v2881_v1 = vsel %vm2875_vm0, %v2873_v50, 0.0  ;;  %v2866_v2 = vmul.f32 %v3773_v41, %v2858_v6  ;;  %3180 = vmatpush1.bf16.msra.mxu0 %v4368_v28  ;;  %v4376_v22 = vld [vmem:[%s5438_s1 + $0x24] ss:$8 sps:$4 sm:$0xff]   ;;  %v4385_v6 = vld [vmem:[%s5438_s1 + $0x54] ss:$8 sps:$4 sm:$0xff]  }
 0xcbd   : > { %v2821_v54 = vadd.f32 %v2819_v43, %v2811_v42  ;;  %v2865_v56 = vmul.f32 %v3773_v41, %v2849_v39  ;;  %v2889_v58 = vmul.f32 %v3774_v53, %v2881_v1  ;;  %v2888_v60 = vmul.f32 %v3774_v53, %v2872_v47  ;;  %3181 = vmatprep.subr.bf16.mxu0 %v4373_v30  ;;  %v4379_v39 = vld [vmem:[%s5438_s1 + $0x34] ss:$8 sps:$4 sm:$0xff]   ;;  %v4382_v41 = vld [vmem:[%s5438_s1 + $0x44] ss:$8 sps:$4 sm:$0xff]   ;;  %v4380_v42 = vld [vmem:[%s5438_s1 + $0x40] ss:$8 sps:$4 sm:$0xff]  }
 0xcbe   : > { %v2845_v49 = vadd.f32 %v2843_v45, %v2822_v44  ;;  %v4383_v43 = vld [vmem:[%s5438_s1 + $0x50] ss:$8 sps:$4 sm:$0xff]   ;;  %v4388_v44 = vld [vmem:[%s5438_s1 + $0x64] ss:$8 sps:$4 sm:$0xff]   ;;  %v4386_v45 = vld [vmem:[%s5438_s1 + $0x60] ss:$8 sps:$4 sm:$0xff]  }
 0xcbf   : > { %v2844_v55 = vadd.f32 %v2842_v48, %v2821_v54  ;;  %v4391_v47 = vld [vmem:[%s5438_s1 + $0x74] ss:$8 sps:$4 sm:$0xff]   ;;  %v4389_v50 = vld [vmem:[%s5438_s1 + $0x70] ss:$8 sps:$4 sm:$0xff]  }
 0xcc0   : > { %v2868_v57 = vadd.f32 %v2866_v2, %v2845_v49  ;;  %3182 = vmatpush1.bf16.msra.mxu0 %v4371_v31 }
 0xcc1   : > { %v2867_v59 = vadd.f32 %v2865_v56, %v2844_v55  ;;  %3183 = vmatprep.subr.bf16.mxu0 %v4376_v22  ;;  %v3787_v56 = vld [vmem:[%s5439_s3] ss:$0 sm:$0xff]  ;;  %s5442_s3 = sld [smem:[#allocation29_spill]] }
 0xcc2   : > { %v2891_v0 = vadd.f32 %v2889_v58, %v2868_v57 }
 0xcc3   : > { %v2890_v4 = vadd.f32 %v2888_v60, %v2867_v59 }
 0xcc4   : > { %v2900_v7 = vmul.f32 %v3775_v61, %v2891_v0  ;;  %3184 = vmatpush1.bf16.msra.mxu0 %v4374_v38 }
 0xcc5   : > { %v2899_v8 = vmul.f32 %v3775_v61, %v2890_v4  ;;  %3185 = vmatprep.subr.bf16.mxu0 %v4379_v39  ;;  %v3788_v61 = vld [vmem:[%s5440_s23] ss:$0 sm:$0xff]  ;;  %s5443_s23 = sld [smem:[#allocation31_spill]] }
 0xcc6   : > { %v2909_v9 = vadd.f32 %v3776_v5, %v2900_v7 }
 0xcc7   : > { %v2908_v10 = vadd.f32 %v3776_v5, %v2899_v8  ;;  %v4392_v8 = vld [vmem:[%s5441_s5 + $0x40] sm:$0xff]  }
 0xcc8   : > { %v3778_v11 = vmul.f32 -1.442695, %v2909_v9  ;;  %3186 = vmatpush1.bf16.msra.mxu0 %v4377_v40  ;;  %3962 = vmatprep.subr.bf16.mxu1 %v4392_v8 }
 0xcc9   : > { %v3777_v12 = vmul.f32 -1.442695, %v2908_v10  ;;  %3187 = vmatprep.subr.bf16.mxu0 %v4382_v41 }
 0xcca   : > { %4476 = vpow2.f32 %v3778_v11  ;;  %v4395_v11 = vld [vmem:[%s5441_s5 + $0x8] sm:$0xff]  }
 0xccb   : > { %4478 = vpow2.f32 %v3777_v12  ;;  %v4396_v12 = vld [vmem:[%s5441_s5 + $0x50] sm:$0xff]  }
 0xccc   : > { %3188 = vmatpush1.bf16.msra.mxu0 %v4380_v42 }
 0xccd   : > { %3189 = vmatprep.subr.bf16.mxu0 %v4385_v6 }
 0xcd0   : > { %3190 = vmatpush1.bf16.msra.mxu0 %v4383_v43 }
 0xcd1   : > { %3191 = vmatprep.subr.bf16.mxu0 %v4388_v44 }
 0xcd4   : > { %v4477_v52 = vpop.eup %4476  ;;  %3192 = vmatpush1.bf16.msra.mxu0 %v4386_v45 }
 0xcd5   : > { %v4479_v13 = vpop.eup %4478  ;;  %v2917_v14 = vadd.f32 1.0, %v4477_v52  ;;  %3193 = vmatprep.subr.bf16.mxu0 %v4391_v47  ;;  %v4397_v52 = vld [vmem:[%s5441_s5 + $0x10] sm:$0xff]  }
 0xcd6   : > { %v2916_v15 = vadd.f32 1.0, %v4479_v13  ;;  %v4398_v13 = vld [vmem:[%s5441_s5 + $0x58] sm:$0xff]  }
 0xcd7   : > { %4480 = vrcp.f32 %v2917_v14  ;;  %v4399_v14 = vld [vmem:[%s5441_s5 + $0x18] sm:$0xff]  }
 0xcd8   : > { %4482 = vrcp.f32 %v2916_v15  ;;  %3194 = vmatpush1.bf16.msra.mxu0 %v4389_v50  ;;  %v4400_v15 = vld [vmem:[%s5441_s5 + $0x60] sm:$0xff]  }
 0xce1   : > { %v4481_v16 = vpop.eup %4480 }
 0xce2   : > { %v4483_v17 = vpop.eup %4482  ;;  %v2923_v18 = vmul.f32 %v4481_v16, %v2909_v9  ;;  %v4393_v9 = vld [vmem:[%s5441_s5] sm:$0xff]  }
 0xce3   : > { %v2922_v19 = vmul.f32 %v4483_v17, %v2908_v10  ;;  %v4394_v10 = vld [vmem:[%s5441_s5 + $0x48] sm:$0xff]   ;;  %v4401_v16 = vld [vmem:[%s5441_s5 + $0x20] sm:$0xff]  }
 0xce4   : > { %v4402_v17 = vld [vmem:[%s5441_s5 + $0x68] sm:$0xff]  }
 0xce5   : > { %v2940_v20 = vpack.c.bf16 %v2923_v18, %v2922_v19  ;;  %v4403_v18 = vld [vmem:[%s5441_s5 + $0x28] sm:$0xff]   ;;  %v4404_v19 = vld [vmem:[%s5441_s5 + $0x70] sm:$0xff]  }
 0xce7   : > { %4169 = vmatmul.mubr.bf16.vlgmr.msra.gmra.mrb[36].mxu1 %v2940_v20  ;;  %v4405_v20 = vld [vmem:[%s5441_s5 + $0x30] sm:$0xff]  }
 0xce8   : > { %3963 = vmatpush3.bf16.msra.mxu1 %v4393_v9 }
 0xce9   : > { %3964 = vmatprep.subr.bf16.mxu1 %v4394_v10 }
 0xcec   : > { %3965 = vmatpush3.bf16.msra.mxu1 %v4395_v11 }
 0xced   : > { %3966 = vmatprep.subr.bf16.mxu1 %v4396_v12 }
 0xcf0   : > { %3967 = vmatpush3.bf16.msra.mxu1 %v4397_v52 }
 0xcf1   : > { %3968 = vmatprep.subr.bf16.mxu1 %v4398_v13 }
 0xcf4   : > { %3969 = vmatpush3.bf16.msra.mxu1 %v4399_v14 }
 0xcf5   : > { %3970 = vmatprep.subr.bf16.mxu1 %v4400_v15 }
 0xcf8   : > { %3971 = vmatpush3.bf16.msra.mxu1 %v4401_v16 }
 0xcf9   : > { %3972 = vmatprep.subr.bf16.mxu1 %v4402_v17 }
 0xcfc   : > { %3973 = vmatpush3.bf16.msra.mxu1 %v4403_v18 }
 0xcfd   : > { %3974 = vmatprep.subr.bf16.mxu1 %v4404_v19 }
 0xd00   : > { %3975 = vmatpush3.bf16.msra.mxu1 %v4405_v20 }
 0xdba   : > { %v3023_v21 = vpop.f32.mrb[36].mxu1 }
 0xdbb   : > { %v5232_v23 = vadd.f32 %v3023_v21, %v5102_v46  ;;  %v4170_v24 = vpop.f32.mrb[37].mxu1  ;;  %v4406_v21 = vld [vmem:[%s5441_s5 + $0x78] sm:$0xff]  }
 0xdbc   : > { %v3026_v25 = vpop.f32.mrb[38].mxu1  ;;  %v4407_v24 = vld [vmem:[%s5441_s5 + $0x38] sm:$0xff]   ;;  %3976 = vmatprep.subr.bf16.mxu1 %v4406_v21 }
 0xdbd   : > { %v5235_v26 = vadd.f32 %v3026_v25, %v5105_v51  ;;  %3032 = vadd.xlane.f32.xlu0 %v5232_v23  ;;  %v4171_v27 = vpop.f32.mrb[39].mxu1  ;;  %3977 = vmatpush3.bf16.msra.mxu1 %v4407_v24  ;;  %v3086_v25 = vld [vmem:[%s5442_s3] sm:$0x3]  ;;  %s5282_s3 = sand.u32 1, %s4594_s16  }
 0xdbe   : > { %v3092_v27 = vrot.slane %v3086_v25, %v1119_v63  ;;  %v3096_v28 = vrot.slane %v3086_v25, %v1123_v3  ;;  %s5385_s1 = sshll.u32 %s5282_s3, 3  ;;  %s3498_s8 = scalar_lea.sflag [#allocation5], %s5282_s3 }
 0xdbf   : > { %3034 = vadd.xlane.f32.xlu1 %v5235_v26 }
 0xe4a   : > { %v3033_v46 = vpop.xlane.xlu0 %3032 }
 0xe4b   : > { %v3036_v51 = vmul.f32 0.0078125, %v3033_v46 }
 0xe4c   : > { %v3035_v32 = vpop.xlane.xlu1 %3034 }
 0xe4d   : > { %v3038_v33 = vsub.f32 %v5232_v23, %v3036_v51  ;;  %v3037_v34 = vmul.f32 0.0078125, %v3035_v32 }
 0xe4f   : > { %v3039_v35 = vsub.f32 %v5235_v26, %v3037_v34  ;;  %v3040_v36 = vmul.f32 %v3038_v33, %v3038_v33 }
 0xe51   : > { %3042 = vadd.xlane.f32.xlu0 %v3040_v36  ;;  %v3041_v37 = vmul.f32 %v3039_v35, %v3039_v35 }
 0xe53   : > { %3044 = vadd.xlane.f32.xlu1 %v3041_v37 }
 0xede   : > { %v3043_v53 = vpop.xlane.xlu0 %3042 }
 0xedf   : > { %v3046_v54 = vmul.f32 0.0078125, %v3043_v53 }
 0xee0   : > { %v3045_v48 = vpop.xlane.xlu1 %3044 }
 0xee1   : > { %v3048_v1 = vadd.f32 1e-05, %v3046_v54  ;;  %v3047_v49 = vmul.f32 0.0078125, %v3045_v48 }
 0xee3   : > { %4484 = vrsqrt.f32 %v3048_v1  ;;  %v3049_v2 = vadd.f32 1e-05, %v3047_v49 }
 0xee5   : > { %4486 = vrsqrt.f32 %v3049_v2  ;;  %v3809_v2 = vld [vmem:[%s5443_s23] ss:$0 sm:$0xff]  ;;  %s1046_s23 = scalar_lea.vmem [#allocation4], %s5385_s1  ;;  %s3845_s1 = sshll.u32 %s4848_s0, 7 }
 0xee6   : > { %s3527_s5 = sshll.u32 %s1046_s23, 4  ;;  %s5293_s6 = scalar_lea.hbm %s5417_s12, %s3845_s1  ;;  %s5295_s5 = int_to_ptr.vmem [resolvable:$true] %s3527_s5 }
 0xee7   : > { %s4508_s9 = scalar_lea.vmem %s5295_s5, 128  ;;  %p4515_p0 = scmp.lt.s32.totalorder %s5295_s5, %s4513_s13 }
 0xee8   : > { %p4509_p11 = scmp.ne.s32.totalorder %s5295_s5, %s4508_s9  ;;  %p4516_p1 = scmp.lt.s32.totalorder %s4514_s14, %s4508_s9 }
 0xeea   : > { %p4510_p12 = pnand %p4509_p11, %p4865_p5  ;;  %p4517_p2 = por %p4516_p1, %p4515_p0 }
 0xeec   : > { %p4511_p13 = pneg %p4510_p12 }
 0xeed   : > { %v4485_v55 = vpop.eup %4484 }
 0xeee   : > { %v3052_v57 = vmul.f32 %v4485_v55, %v3038_v33  ;;  %p4518_p3 = pnand %p4517_p2, %p4511_p13 }
 0xeef   : > { %v4487_v58 = vpop.eup %4486 }
 0xef0   : > { %v3053_v59 = vmul.f32 %v4487_v58, %v3039_v35  ;;  %v3060_v60 = vmul.f32 %v3787_v56, %v3052_v57 }
 0xef2   : > { %v3061_v0 = vmul.f32 %v3787_v56, %v3053_v59  ;;  %v3068_v4 = vadd.f32 %v3788_v61, %v3060_v60 }
 0xef4   : > { %v3069_v5 = vadd.f32 %v3788_v61, %v3061_v0 }
 0xef6   : > { %v3087_v7 = vpack.c.bf16 %v3069_v5, %v3068_v4 }
 0xef8   : > { %3212 = vmatmul.mubr.bf16.vlgmr.msra.gmra.mrb[28].mxu0 %v3087_v7 }
 0xfcb   : > { %v3213_v29 = vpop.f32.mrb[28].mxu0 }
 0xfcc   : > { %v3214_v30 = vadd.f32 %v3213_v29, %v3092_v27  ;;  %v3215_v31 = vpop.f32.mrb[29].mxu0 }
 0xfcd   : > { %v3216_v46 = vadd.f32 %v3215_v31, %v3096_v28  ;;  %v3217_v51 = vpop.f32.mrb[30].mxu0 }
 0xfce   : > { %v3805_v32 = vmul.f32 -1.442695, %v3214_v30  ;;  %v3218_v33 = vadd.f32 %v3217_v51, %v3092_v27  ;;  %v3219_v34 = vpop.f32.mrb[31].mxu0 }
 0xfcf   : > { %v3806_v35 = vmul.f32 -1.442695, %v3216_v46  ;;  %v3220_v36 = vadd.f32 %v3219_v34, %v3096_v28 }
 0xfd0   : > { %4488 = vpow2.f32 %v3805_v32  ;;  %v3807_v37 = vmul.f32 -1.442695, %v3218_v33 }
 0xfd1   : > { %4490 = vpow2.f32 %v3806_v35  ;;  %v3808_v22 = vmul.f32 -1.442695, %v3220_v36 }
 0xfd2   : > { %4492 = vpow2.f32 %v3807_v37 }
 0xfd3   : > { %4494 = vpow2.f32 %v3808_v22 }
 0xfda   : > { %v4489_v63 = vpop.eup %4488 }
 0xfdb   : > { %v4491_v38 = vpop.eup %4490  ;;  %v3234_v62 = vadd.f32 1.0, %v4489_v63 }
 0xfdc   : > { %v4493_v3 = vpop.eup %4492  ;;  %v3235_v39 = vadd.f32 1.0, %v4491_v38 }
 0xfdd   : > { %v4495_v40 = vpop.eup %4494  ;;  %4496 = vrcp.f32 %v3234_v62  ;;  %v3236_v41 = vadd.f32 1.0, %v4493_v3 }
 0xfde   : > { %4498 = vrcp.f32 %v3235_v39  ;;  %v3237_v42 = vadd.f32 1.0, %v4495_v40 }
 0xfdf   : > { %4500 = vrcp.f32 %v3236_v41 }
 0xfe0   : > { %4502 = vrcp.f32 %v3237_v42 }
 0xfe7   : > { %v4497_v43 = vpop.eup %4496 }
 0xfe8   : > { %v4499_v6 = vpop.eup %4498  ;;  %v3246_v47 = vmul.f32 %v4497_v43, %v3214_v30 }
 0xfe9   : > { %v4501_v44 = vpop.eup %4500  ;;  %v3247_v53 = vmul.f32 %v4499_v6, %v3216_v46 }
 0xfea   : > { %v4503_v45 = vpop.eup %4502  ;;  %v3248_v50 = vmul.f32 %v4501_v44, %v3218_v33 }
 0xfeb   : > { %v3249_v54 = vmul.f32 %v4503_v45, %v3220_v36 }
 0xfec   : > { %v3283_v48 = vpack.c.bf16 %v3248_v50, %v3246_v47 }
 0xfed   : > { %v3284_v1 = vpack.c.bf16 %v3249_v54, %v3247_v53 }
 0xfef   : > { %3419 = vmatprep.mubr.bf16.mxu1 %v3284_v1 }
 0xff0   : > { %3420 = vmatmul.mubr.bf16.vlgmr.msra.gmra.mrb[40].mxu1 %v3283_v48 }
0x10c3   : > { %v3978_v49 = vpop.f32.mrb[40].mxu1 }
0x10c4   : > { %v3979_v55 = vpop.f32.mrb[41].mxu1 }
0x10c5   : > { %v3980_v56 = vadd.f32 %v3979_v55, %v3978_v49  ;;  %v3981_v57 = vpop.f32.mrb[42].mxu1 }
0x10c6   : > { %v3982_v58 = vpop.f32.mrb[43].mxu1 }
0x10c7   : > { %v3422_v59 = vadd.f32 %v3980_v56, %v3809_v2  ;;  %v3983_v60 = vadd.f32 %v3982_v58, %v3981_v57 }
0x10c9   : > { %v3425_v61 = vadd.f32 %v3983_v60, %v3809_v2  ;;  %v3428_v0 = vmul.f32 0.5, %v3422_v59 }
0x10cb   : > { %v3859_v4 = vpack.c.bf16 %v3425_v61, %v3422_v59  ;;  %v3430_v5 = vadd.f32 %v3428_v0, %v5232_v23  ;;  %v3429_v7 = vmul.f32 0.5, %v3425_v61 }
0x10cd   : > { %3860 = vst [vmem:[%s1046_s23] sm:$0xff] %v3859_v4   ;;  %3434 = vadd.xlane.f32.xlu0 %v3430_v5  ;;  %v3431_v8 = vadd.f32 %v3429_v7, %v5235_v26 }
0x10cf   : > { %3436 = vadd.xlane.f32.xlu1 %v3431_v8 }
0x115a   : > { %v3435_v9 = vpop.xlane.xlu0 %3434 }
0x115b   : > { %v3438_v10 = vmul.f32 0.0078125, %v3435_v9 }
0x115c   : > { %v3437_v11 = vpop.xlane.xlu1 %3436 }
0x115d   : > { %v3440_v12 = vsub.f32 %v3430_v5, %v3438_v10  ;;  %v3439_v52 = vmul.f32 0.0078125, %v3437_v11 }
0x115f   : > { %v3441_v13 = vsub.f32 %v3431_v8, %v3439_v52  ;;  %v3442_v23 = vmul.f32 %v3440_v12, %v3440_v12 }
0x1161   : > { %3444 = vadd.xlane.f32.xlu0 %v3442_v23  ;;  %v3443_v14 = vmul.f32 %v3441_v13, %v3441_v13 }
0x1163   : > { %3446 = vadd.xlane.f32.xlu1 %v3443_v14 }
0x1164   : > { %4521 = shalt.err (!%p4518_p3)
}
0x1165   : > { %s4522_s23 = scalar_lea.hbm %s5293_s6, 128  ;;  %s4526_s11 = scalar_lea.hbm %s5417_s12, 256 }
0x1166   : > { %p4523_p4 = scmp.ne.s32.totalorder %s5293_s6, %s4522_s23  ;;  %p4527_p9 = scmp.lt.u32.totalorder %s5293_s6, %s5417_s12 }
0x1167   : > { %p4528_p10 = scmp.lt.u32.totalorder %s4526_s11, %s4522_s23  ;;  %p4530_p12 = scmp.lt.u32.totalorder %s4522_s23, %s5293_s6 }
0x1168   : > { %p4524_p7 = pnand %p4523_p4, %p4865_p5 }
0x1169   : > { %p4529_p11 = por %p4528_p10, %p4527_p9 }
0x116a   : > { %p4525_p8 = pneg %p4524_p7 }
0x116b   : > { %p4531_p0 = por %p4530_p12, %p4529_p11 }
0x116d   : > { %p4532_p13 = pnand %p4531_p0, %p4525_p8 }
0x116f   : > { %4535 = shalt.err (!%p4532_p13)
}
0x1170   : > { %s5390_s9 = smov 4   ;;  %s5444_s13 = smov 64   ;;  %v3826_v21 = vld [vmem:[%s4810_s20] ss:$0 sm:$0xff] }
0x1171   : > { %4173 = dma.vmem_to_hbm [thread:$0]  (%p4865_p5), %s5295_s5, 128, %s5293_s6, %s3498_s8, %s5444_s13, %s5444_s13, %s5390_s9  }
0x1172   : > { %v3827_v29 = vld [vmem:[%s4815_s27] ss:$0 sm:$0xff]  ;;  %s5445_s5 = sshll.u32 %s5282_s3, 3  ;;  %s5327_s6 = scalar_lea.hbm %s4820_s4, %s3845_s1 }
0x1173   : > { %s1039_s8 = scalar_lea.vmem [#allocation2], %s5445_s5  ;;  %s3493_s23 = scalar_lea.sflag [#allocation3], %s5282_s3 }
0x1174   : > { %s3511_s14 = sshll.u32 %s1039_s8, 4  ;;  %s4646_s5 = smov [#allocation2]   ;;  %s5329_s14 = int_to_ptr.vmem [resolvable:$true] %s3511_s14 }
0x1175   : > { %s4536_s11 = scalar_lea.vmem %s5329_s14, 128  ;;  %s4540_s9 = sshll.u32 %s4646_s5, 4  ;;  %s4541_s9 = int_to_ptr.vmem [resolvable:$false] %s4540_s9 }
0x1176   : > { %p4537_p1 = scmp.ne.s32.totalorder %s5329_s14, %s4536_s11  ;;  %s4542_s12 = scalar_lea.vmem %s4541_s9, 256 }
0x1177   : > { %p4543_p4 = scmp.lt.s32.totalorder %s5329_s14, %s4541_s9  ;;  %p4544_p7 = scmp.lt.s32.totalorder %s4542_s12, %s4536_s11 }
0x1178   : > { %p4538_p2 = pnand %p4537_p1, %p4865_p5 }
0x1179   : > { %p4545_p8 = por %p4544_p7, %p4543_p4 }
0x117a   : > { %p4539_p3 = pneg %p4538_p2 }
0x117c   : > { %p4546_p9 = pnand %p4545_p8, %p4539_p3 }
0x11ee   : > { %v3445_v26 = vpop.xlane.xlu0 %3444 }
0x11ef   : > { %v3448_v15 = vmul.f32 0.0078125, %v3445_v26 }
0x11f0   : > { %v3447_v16 = vpop.xlane.xlu1 %3446 }
0x11f1   : > { %v3450_v17 = vadd.f32 1e-05, %v3448_v15  ;;  %v3449_v18 = vmul.f32 0.0078125, %v3447_v16 }
0x11f3   : > { %4504 = vrsqrt.f32 %v3450_v17  ;;  %v3451_v19 = vadd.f32 1e-05, %v3449_v18 }
0x11f5   : > { %4506 = vrsqrt.f32 %v3451_v19 }
0x11fd   : > { %v4505_v20 = vpop.eup %4504 }
0x11fe   : > { %v3454_v24 = vmul.f32 %v4505_v20, %v3440_v12 }
0x11ff   : > { %v4507_v25 = vpop.eup %4506 }
0x1200   : > { %v3462_v27 = vmul.f32 %v3826_v21, %v3454_v24  ;;  %v3455_v28 = vmul.f32 %v4507_v25, %v3441_v13 }
0x1202   : > { %v3463_v30 = vmul.f32 %v3826_v21, %v3455_v28  ;;  %v3470_v31 = vadd.f32 %v3827_v29, %v3462_v27 }
0x1204   : > { %v3471_v46 = vadd.f32 %v3827_v29, %v3463_v30 }
0x1206   : > { %v3854_v51 = vpack.c.bf16 %v3471_v46, %v3470_v31 }
0x1208   : > { %3855 = vst [vmem:[%s1039_s8] sm:$0xff] %v3854_v51  }
0x1209   : > { %4549 = shalt.err (!%p4546_p9)
}
0x120a   : > { %s4550_s0 = scalar_lea.hbm %s5327_s6, 128  ;;  %s4554_s1 = scalar_lea.hbm %s4820_s4, 256 }
0x120b   : > { %p4551_p10 = scmp.ne.s32.totalorder %s5327_s6, %s4550_s0  ;;  %p4555_p0 = scmp.lt.u32.totalorder %s5327_s6, %s4820_s4 }
0x120c   : > { %p4556_p13 = scmp.lt.u32.totalorder %s4554_s1, %s4550_s0  ;;  %p4558_p2 = scmp.lt.u32.totalorder %s4550_s0, %s5327_s6 }
0x120d   : > { %p4552_p11 = pnand %p4551_p10, %p4865_p5 }
0x120e   : > { %p4557_p1 = por %p4556_p13, %p4555_p0 }
0x120f   : > { %p4553_p12 = pneg %p4552_p11 }
0x1210   : > { %p4559_p4 = por %p4558_p2, %p4557_p1 }
0x1212   : > { %p4560_p3 = pnand %p4559_p4, %p4553_p12 }
0x1214   : > { %4563 = shalt.err (!%p4560_p3)
}
0x1215   : > { %s5446_s12 = smov 4  }
0x1216   : > { %4172 = dma.vmem_to_hbm [thread:$0]  (%p4865_p5), %s5329_s14, 128, %s5327_s6, %s3493_s23, %s5444_s13, %s5444_s13, %s5446_s12  }
0x1217 PF: > { %p4183_p7 = scmp.ge.s32.totalorder %s4602_s22, 2  ;;  %s3542_s9 = sand.u32 1, %s4590_s15  }
0x1218   : > { %s3543_s8 = scalar_lea.sflag [#allocation3], %s3542_s9 }
0x1219   : > { %p4177_p8 = pnand %p4183_p7, %p4869_p6 }
0x121b   : > { %4581 = dma.done.wait (!%p4177_p8), %s3543_s8, 128  }
0x121c   : > { %4583 = vsyncadd (!%p4177_p8), %s3543_s8, 4294967168  ;;  %s3552_s7 = scalar_lea.sflag [#allocation5], %s3542_s9 }
0x121d   : > { %4585 = dma.done.wait (!%p4177_p8), %s3552_s7, 128  }
0x121e   : > { %4587 = vsyncadd (!%p4177_p8), %s3552_s7, 4294967168  ;;  %p83_p5 = scmp.ge.s32.totalorder %s4852_s26, 4   ;;  %s5447_s15 = smov %s4594_s16 }
0x121f   : > { %s5448_s16 = smov %s4598_s18  ;;  %s5449_s18 = smov %s4863_s2 }
0x1220   : > { %s5450_s22 = smov %s4852_s26  ;;  %85 = sbr.rel (!%p83_p5) target bundleno = 80 (0x50), region = 238 }
0x1227   :  { %3557 = vsyncpa [#allocation3], 1 }
0x1228   :  { %3559 = vsyncpa [#allocation3 + $0x1], 1 }
0x1229   :  { %3560 = vsyncpa [#allocation5], 1 }
0x122a   :  { %3562 = vsyncpa [#allocation5 + $0x1], 1 }

</bundles_post_ra>
